<compile_context>
chip_gen: v7x
topology: tpu7x:2x2x1
jax: 0.10.0
libtpu: 0.0.40
codegen_flags: <defaults>
</compile_context>

<pallas_src>
import jax
import jax.numpy as jnp
from jax.experimental import pallas as pl
from jax.experimental.pallas import tpu as pltpu

_LANE = 128   # TPU lane width
_SUB = 8      # sublane multiple


def _mlp_kernel(x_ref, w1_ref, b1_ref, w2_ref, b2_ref,
                w3_ref, b3_ref, w4_ref, b4_ref, o_ref):
    # All four layers fused; the full (padded) weight stack (<1 MiB f32) lives
    # in VMEM.  Matmuls accumulate in f32; activations are cast back to the
    # weight dtype so the same kernel serves both the f32 and bf16 paths.
    h = jnp.dot(x_ref[...], w1_ref[...], preferred_element_type=jnp.float32)
    h = jnp.maximum(h + b1_ref[...], 0.0).astype(w2_ref.dtype)
    h = jnp.dot(h, w2_ref[...], preferred_element_type=jnp.float32)
    h = jnp.maximum(h + b2_ref[...], 0.0).astype(w3_ref.dtype)
    h = jnp.dot(h, w3_ref[...], preferred_element_type=jnp.float32)
    h = jnp.maximum(h + b3_ref[...], 0.0).astype(w4_ref.dtype)
    h = jnp.dot(h, w4_ref[...], preferred_element_type=jnp.float32) + b4_ref[...]
    o_ref[...] = h.astype(o_ref.dtype)


def _round_up(x, m):
    return (x + m - 1) // m * m


def _num_tensorcores_per_chip():
    """Best-effort detection: v7x has 2 TensorCores per chip, v5e/v6e have 1."""
    try:
        kind = jax.devices()[0].device_kind.lower()
        if "v7" in kind:
            return 2
    except Exception:
        pass
    return 1


def _choose_tile_b(B, num_tc):
    """Batch tile selection.

    v5e/v6e (single TC): one big tile (<=1024 rows) -- extra grid steps only
    add ~0.35us/step loop overhead.  v7x (2 TCs): keep >=2 grid steps so the
    'parallel' grid axis is sharded across both TensorCores.
    """
    b8 = _round_up(B, _SUB)
    if num_tc > 1 and B >= 2 * _SUB:
        half = _round_up((B + 1) // 2, _SUB)
        return min(half, 1024)
    return min(b8, 1024)


def prepare_params(params, compute_dtype=jnp.float32):
    """Pad the 64-wide hidden dim to 128 lanes and cast weights to compute_dtype.

    Call this ONCE and cache the result (doing it per forward call adds ~8
    small XLA ops and HBM round-trips).  Biases stay f32: they are added onto
    the f32 accumulator inside the kernel.  Zero padding is numerically exact.
    """
    compute_dtype = jnp.dtype(compute_dtype)
    d_h3 = params["w3"].shape[1]          # 64
    pad = _LANE - d_h3                    # pad hidden 64 -> 128 lanes
    w1 = params["w1"].astype(compute_dtype)
    w2 = params["w2"].astype(compute_dtype)
    w3 = jnp.pad(params["w3"], ((0, 0), (0, pad))).astype(compute_dtype)
    w4 = jnp.pad(params["w4"], ((0, pad), (0, 0))).astype(compute_dtype)
    b1 = params["b1"].astype(jnp.float32)
    b2 = params["b2"].astype(jnp.float32)
    b3 = jnp.pad(params["b3"], ((0, 0), (0, pad))).astype(jnp.float32)
    b4 = params["b4"].astype(jnp.float32)
    return (w1, b1, w2, b2, w3, b3, w4, b4)


def dimensionality_reduction_net(x, params=None, *, prepared=None, tile_b=None,
                                 compute_dtype=jnp.float32):
    """x: (B, 512).  params: w1..w4 (in, out), b1..b4 (1, out).  Returns (B, 20) f32.

    Pass `prepared=prepare_params(params[, bfloat16])` to skip per-call
    padding/casting.  For the bf16 path, keep x in bf16 in HBM upstream.
    """
    B, D_in = x.shape
    assert D_in == 512, f"expected 512 input features, got {D_in}"

    if prepared is None:
        prepared = prepare_params(params, compute_dtype)
    w1, b1, w2, b2, w3, b3, w4, b4 = prepared
    compute_dtype = w1.dtype
    if x.dtype != compute_dtype:
        x = x.astype(compute_dtype)   # NOTE: extra HBM pass; pre-cast upstream if possible

    d_out = w4.shape[1]               # 20
    h3_p = w3.shape[1]                # 128 (padded hidden)

    if tile_b is None:
        tile_b = _choose_tile_b(B, _num_tensorcores_per_chip())
    grid = (pl.cdiv(B, tile_b),)

    out_spec = pl.BlockSpec((tile_b, d_out), lambda i: (i, 0))

    itemsize = jnp.dtype(compute_dtype).itemsize
    flops = 2 * B * (512 * 256 + 256 * 128 + 128 * h3_p + h3_p * d_out)
    weight_bytes = sum(int(a.size) * a.dtype.itemsize for a in prepared)
    cost = pl.CostEstimate(
        flops=int(flops),
        transcendentals=0,
        bytes_accessed=int(B * D_in * itemsize + B * d_out * 4 + weight_bytes),
    )

    def _make_in_specs(weight_pipeline_mode):
        wkw = ({} if weight_pipeline_mode is None
               else {"pipeline_mode": weight_pipeline_mode})
        rep = lambda i: (0, 0)        # grid-invariant blocks
        return [
            pl.BlockSpec((tile_b, D_in), lambda i: (i, 0)),
            pl.BlockSpec(w1.shape, rep, **wkw),
            pl.BlockSpec(b1.shape, rep, **wkw),
            pl.BlockSpec(w2.shape, rep, **wkw),
            pl.BlockSpec(b2.shape, rep, **wkw),
            pl.BlockSpec(w3.shape, rep, **wkw),
            pl.BlockSpec(b3.shape, rep, **wkw),
            pl.BlockSpec(w4.shape, rep, **wkw),
            pl.BlockSpec(b4.shape, rep, **wkw),
        ]

    def _call(in_specs):
        return pl.pallas_call(
            _mlp_kernel,
            out_shape=jax.ShapeDtypeStruct((B, d_out), jnp.float32),
            grid_spec=pltpu.PrefetchScalarGridSpec(
                num_scalar_prefetch=0,
                grid=grid,
                in_specs=in_specs,
                out_specs=out_spec,
            ),
            compiler_params=pltpu.CompilerParams(
                dimension_semantics=("parallel",),
                vmem_limit_bytes=32 * 1024 * 1024,   # v5e default scoped limit is 16 MiB
            ),
            cost_estimate=cost,
        )(x, w1, b1, w2, b2, w3, b3, w4, b4)

    try:
        # Grid-invariant weight/bias blocks: single-buffered (halves their VMEM).
        return _call(_make_in_specs(pl.Buffered(1)))
    except Exception:
        # Fallback if this jax version rejects Buffered(1) on a pallas_call
        # BlockSpec; default double-buffering costs <1 MiB extra VMEM here.
        return _call(_make_in_specs(None))


def init_params(key):
    """Deterministic init mimicking nn.Linear default (uniform +/- 1/sqrt(fan_in))."""
    dims = [(512, 256), (256, 128), (128, 64), (64, 20)]
    params = {}
    for idx, (fan_in, fan_out) in enumerate(dims, start=1):
        key, kw, kb = jax.random.split(key, 3)
        bound = 1.0 / jnp.sqrt(fan_in)
        params[f"w{idx}"] = jax.random.uniform(
            kw, (fan_in, fan_out), jnp.float32, -bound, bound)
        params[f"b{idx}"] = jax.random.uniform(
            kb, (1, fan_out), jnp.float32, -bound, bound)
    return params


def reference_forward(x, params):
    h = jnp.maximum(x @ params["w1"] + params["b1"], 0.0)
    h = jnp.maximum(h @ params["w2"] + params["b2"], 0.0)
    h = jnp.maximum(h @ params["w3"] + params["b3"], 0.0)
    return h @ params["w4"] + params["b4"]


if __name__ == "__main__":
    key = jax.random.PRNGKey(0)
    key, kx = jax.random.split(key)
    B = 8
    x = jax.random.normal(kx, (B, 512), jnp.float32)
    params = init_params(key)

    # Pad / cast once (hoisted out of the per-call path), then run the kernel.
    prepared = prepare_params(params)                       # f32 path (exact)
    out = dimensionality_reduction_net(x, params, prepared=prepared)
    out = jax.block_until_ready(out)

    ref = reference_forward(x, params)
    assert out.shape == (B, 20), out.shape
    assert jnp.allclose(out, ref, atol=1e-4, rtol=1e-4), "mismatch vs reference"
    print("KERNEL_OK")
</pallas_src>

<mosaic_0001>
module attributes {stable_mosaic.version = 11 : i64} {
  func.func @_mlp_kernel(%arg0: i32, %arg1: memref<8x512xf32, #tpu.memory_space<vmem>>, %arg2: memref<512x256xf32, #tpu.memory_space<vmem>>, %arg3: memref<1x256xf32, #tpu.memory_space<vmem>>, %arg4: memref<256x128xf32, #tpu.memory_space<vmem>>, %arg5: memref<1x128xf32, #tpu.memory_space<vmem>>, %arg6: memref<128x128xf32, #tpu.memory_space<vmem>>, %arg7: memref<1x128xf32, #tpu.memory_space<vmem>>, %arg8: memref<128x20xf32, #tpu.memory_space<vmem>>, %arg9: memref<1x20xf32, #tpu.memory_space<vmem>>, %arg10: memref<8x20xf32, #tpu.memory_space<vmem>>) attributes {dimension_semantics = [#tpu.dimension_semantics<parallel>], iteration_bounds = array<i64: 1>, scalar_prefetch = 0 : i64, scratch_operands = 0 : i64, tpu.core_type = #tpu.core_type<tc>, window_params = [{transform_indices = @transform_0, window_bounds = array<i64: 8, 512>}, {pipeline_mode = #tpu.pipeline_mode<synchronous>, transform_indices = @transform_1, window_bounds = array<i64: 512, 256>}, {pipeline_mode = #tpu.pipeline_mode<synchronous>, transform_indices = @transform_2, window_bounds = array<i64: 1, 256>}, {pipeline_mode = #tpu.pipeline_mode<synchronous>, transform_indices = @transform_3, window_bounds = array<i64: 256, 128>}, {pipeline_mode = #tpu.pipeline_mode<synchronous>, transform_indices = @transform_4, window_bounds = array<i64: 1, 128>}, {pipeline_mode = #tpu.pipeline_mode<synchronous>, transform_indices = @transform_5, window_bounds = array<i64: 128, 128>}, {pipeline_mode = #tpu.pipeline_mode<synchronous>, transform_indices = @transform_6, window_bounds = array<i64: 1, 128>}, {pipeline_mode = #tpu.pipeline_mode<synchronous>, transform_indices = @transform_7, window_bounds = array<i64: 128, 20>}, {pipeline_mode = #tpu.pipeline_mode<synchronous>, transform_indices = @transform_8, window_bounds = array<i64: 1, 20>}, {transform_indices = @transform_9, window_bounds = array<i64: 8, 20>}]} {
    %c0 = arith.constant 0 : index
    %c0_0 = arith.constant 0 : index
    %0 = vector.load %arg1[%c0, %c0_0] : memref<8x512xf32, #tpu.memory_space<vmem>>, vector<8x512xf32>
    %c0_1 = arith.constant 0 : index
    %c0_2 = arith.constant 0 : index
    %1 = vector.load %arg2[%c0_1, %c0_2] : memref<512x256xf32, #tpu.memory_space<vmem>>, vector<512x256xf32>
    %cst = arith.constant dense<0.000000e+00> : vector<8x256xf32>
    %2 = tpu.matmul %0, %1, %cst {dimension_numbers = #tpu.dot_dimension_numbers<[1], [0], [0], [1], [0, 0, 1, 1], [], []>} : vector<8x512xf32>, vector<512x256xf32>, vector<8x256xf32> -> vector<8x256xf32>
    %c0_3 = arith.constant 0 : index
    %c0_4 = arith.constant 0 : index
    %3 = vector.load %arg3[%c0_3, %c0_4] : memref<1x256xf32, #tpu.memory_space<vmem>>, vector<1x256xf32>
    %4 = vector.broadcast %3 : vector<1x256xf32> to vector<8x256xf32>
    %5 = arith.addf %2, %4 : vector<8x256xf32>
    %cst_5 = arith.constant 0.000000e+00 : f32
    %6 = vector.broadcast %cst_5 : f32 to vector<8x256xf32>
    %7 = arith.maximumf %5, %6 : vector<8x256xf32>
    %c0_6 = arith.constant 0 : index
    %c0_7 = arith.constant 0 : index
    %8 = vector.load %arg4[%c0_6, %c0_7] : memref<256x128xf32, #tpu.memory_space<vmem>>, vector<256x128xf32>
    %cst_8 = arith.constant dense<0.000000e+00> : vector<8x128xf32>
    %9 = tpu.matmul %7, %8, %cst_8 {dimension_numbers = #tpu.dot_dimension_numbers<[1], [0], [0], [1], [0, 0, 1, 1], [], []>} : vector<8x256xf32>, vector<256x128xf32>, vector<8x128xf32> -> vector<8x128xf32>
    %c0_9 = arith.constant 0 : index
    %c0_10 = arith.constant 0 : index
    %10 = vector.load %arg5[%c0_9, %c0_10] : memref<1x128xf32, #tpu.memory_space<vmem>>, vector<1x128xf32>
    %11 = vector.broadcast %10 : vector<1x128xf32> to vector<8x128xf32>
    %12 = arith.addf %9, %11 : vector<8x128xf32>
    %cst_11 = arith.constant 0.000000e+00 : f32
    %13 = vector.broadcast %cst_11 : f32 to vector<8x128xf32>
    %14 = arith.maximumf %12, %13 : vector<8x128xf32>
    %c0_12 = arith.constant 0 : index
    %c0_13 = arith.constant 0 : index
    %15 = vector.load %arg6[%c0_12, %c0_13] : memref<128x128xf32, #tpu.memory_space<vmem>>, vector<128x128xf32>
    %cst_14 = arith.constant dense<0.000000e+00> : vector<8x128xf32>
    %16 = tpu.matmul %14, %15, %cst_14 {dimension_numbers = #tpu.dot_dimension_numbers<[1], [0], [0], [1], [0, 0, 1, 1], [], []>} : vector<8x128xf32>, vector<128x128xf32>, vector<8x128xf32> -> vector<8x128xf32>
    %c0_15 = arith.constant 0 : index
    %c0_16 = arith.constant 0 : index
    %17 = vector.load %arg7[%c0_15, %c0_16] : memref<1x128xf32, #tpu.memory_space<vmem>>, vector<1x128xf32>
    %18 = vector.broadcast %17 : vector<1x128xf32> to vector<8x128xf32>
    %19 = arith.addf %16, %18 : vector<8x128xf32>
    %cst_17 = arith.constant 0.000000e+00 : f32
    %20 = vector.broadcast %cst_17 : f32 to vector<8x128xf32>
    %21 = arith.maximumf %19, %20 : vector<8x128xf32>
    %c0_18 = arith.constant 0 : index
    %c0_19 = arith.constant 0 : index
    %22 = vector.load %arg8[%c0_18, %c0_19] : memref<128x20xf32, #tpu.memory_space<vmem>>, vector<128x20xf32>
    %cst_20 = arith.constant dense<0.000000e+00> : vector<8x20xf32>
    %23 = tpu.matmul %21, %22, %cst_20 {dimension_numbers = #tpu.dot_dimension_numbers<[1], [0], [0], [1], [0, 0, 1, 1], [], []>} : vector<8x128xf32>, vector<128x20xf32>, vector<8x20xf32> -> vector<8x20xf32>
    %c0_21 = arith.constant 0 : index
    %c0_22 = arith.constant 0 : index
    %24 = vector.load %arg9[%c0_21, %c0_22] : memref<1x20xf32, #tpu.memory_space<vmem>>, vector<1x20xf32>
    %25 = vector.broadcast %24 : vector<1x20xf32> to vector<8x20xf32>
    %26 = arith.addf %23, %25 : vector<8x20xf32>
    %c0_23 = arith.constant 0 : index
    %c0_24 = arith.constant 0 : index
    %27 = vector.load %arg10[%c0_23, %c0_24] : memref<8x20xf32, #tpu.memory_space<vmem>>, vector<8x20xf32>
    tpu.vector_store %arg10[%c0_23, %c0_24], %26 {strides = array<i32>} : memref<8x20xf32, #tpu.memory_space<vmem>>, vector<8x20xf32>,
    return
  }
  func.func @transform_0(%arg0: i32) -> (i32, i32) {
    %c0_i32 = arith.constant 0 : i32
    %c0_i32_0 = arith.constant 0 : i32
    return %arg0, %c0_i32 : i32, i32
  }
  func.func @transform_1(%arg0: i32) -> (i32, i32) {
    %c0_i32 = arith.constant 0 : i32
    %c0_i32_0 = arith.constant 0 : i32
    %c0_i32_1 = arith.constant 0 : i32
    return %c0_i32, %c0_i32_0 : i32, i32
  }
  func.func @transform_2(%arg0: i32) -> (i32, i32) {
    %c0_i32 = arith.constant 0 : i32
    %c0_i32_0 = arith.constant 0 : i32
    %c0_i32_1 = arith.constant 0 : i32
    return %c0_i32, %c0_i32_0 : i32, i32
  }
  func.func @transform_3(%arg0: i32) -> (i32, i32) {
    %c0_i32 = arith.constant 0 : i32
    %c0_i32_0 = arith.constant 0 : i32
    %c0_i32_1 = arith.constant 0 : i32
    return %c0_i32, %c0_i32_0 : i32, i32
  }
  func.func @transform_4(%arg0: i32) -> (i32, i32) {
    %c0_i32 = arith.constant 0 : i32
    %c0_i32_0 = arith.constant 0 : i32
    %c0_i32_1 = arith.constant 0 : i32
    return %c0_i32, %c0_i32_0 : i32, i32
  }
  func.func @transform_5(%arg0: i32) -> (i32, i32) {
    %c0_i32 = arith.constant 0 : i32
    %c0_i32_0 = arith.constant 0 : i32
    %c0_i32_1 = arith.constant 0 : i32
    return %c0_i32, %c0_i32_0 : i32, i32
  }
  func.func @transform_6(%arg0: i32) -> (i32, i32) {
    %c0_i32 = arith.constant 0 : i32
    %c0_i32_0 = arith.constant 0 : i32
    %c0_i32_1 = arith.constant 0 : i32
    return %c0_i32, %c0_i32_0 : i32, i32
  }
  func.func @transform_7(%arg0: i32) -> (i32, i32) {
    %c0_i32 = arith.constant 0 : i32
    %c0_i32_0 = arith.constant 0 : i32
    %c0_i32_1 = arith.constant 0 : i32
    return %c0_i32, %c0_i32_0 : i32, i32
  }
  func.func @transform_8(%arg0: i32) -> (i32, i32) {
    %c0_i32 = arith.constant 0 : i32
    %c0_i32_0 = arith.constant 0 : i32
    %c0_i32_1 = arith.constant 0 : i32
    return %c0_i32, %c0_i32_0 : i32, i32
  }
  func.func @transform_9(%arg0: i32) -> (i32, i32) {
    %c0_i32 = arith.constant 0 : i32
    %c0_i32_0 = arith.constant 0 : i32
    return %arg0, %c0_i32 : i32, i32
  }
}

module attributes {stable_mosaic.version = 11 : i64} {
  func.func @_mlp_kernel(%arg0: i32, %arg1: memref<8x512xf32, #tpu.memory_space<vmem>>, %arg2: memref<512x256xf32, #tpu.memory_space<vmem>>, %arg3: memref<1x256xf32, #tpu.memory_space<vmem>>, %arg4: memref<256x128xf32, #tpu.memory_space<vmem>>, %arg5: memref<1x128xf32, #tpu.memory_space<vmem>>, %arg6: memref<128x128xf32, #tpu.memory_space<vmem>>, %arg7: memref<1x128xf32, #tpu.memory_space<vmem>>, %arg8: memref<128x20xf32, #tpu.memory_space<vmem>>, %arg9: memref<1x20xf32, #tpu.memory_space<vmem>>, %arg10: memref<8x20xf32, #tpu.memory_space<vmem>>) attributes {dimension_semantics = [#tpu.dimension_semantics<parallel>], iteration_bounds = array<i64: 1>, scalar_prefetch = 0 : i64, scratch_operands = 0 : i64, tpu.core_type = #tpu.core_type<tc>, window_params = [{transform_indices = @transform_0, window_bounds = array<i64: 8, 512>}, {pipeline_mode = #tpu.pipeline_mode<synchronous>, transform_indices = @transform_1, window_bounds = array<i64: 512, 256>}, {pipeline_mode = #tpu.pipeline_mode<synchronous>, transform_indices = @transform_2, window_bounds = array<i64: 1, 256>}, {pipeline_mode = #tpu.pipeline_mode<synchronous>, transform_indices = @transform_3, window_bounds = array<i64: 256, 128>}, {pipeline_mode = #tpu.pipeline_mode<synchronous>, transform_indices = @transform_4, window_bounds = array<i64: 1, 128>}, {pipeline_mode = #tpu.pipeline_mode<synchronous>, transform_indices = @transform_5, window_bounds = array<i64: 128, 128>}, {pipeline_mode = #tpu.pipeline_mode<synchronous>, transform_indices = @transform_6, window_bounds = array<i64: 1, 128>}, {pipeline_mode = #tpu.pipeline_mode<synchronous>, transform_indices = @transform_7, window_bounds = array<i64: 128, 20>}, {pipeline_mode = #tpu.pipeline_mode<synchronous>, transform_indices = @transform_8, window_bounds = array<i64: 1, 20>}, {transform_indices = @transform_9, window_bounds = array<i64: 8, 20>}]} {
    %c0 = arith.constant 0 : index
    %c0_0 = arith.constant 0 : index
    %0 = vector.load %arg1[%c0, %c0_0] : memref<8x512xf32, #tpu.memory_space<vmem>>, vector<8x512xf32>
    %c0_1 = arith.constant 0 : index
    %c0_2 = arith.constant 0 : index
    %1 = vector.load %arg2[%c0_1, %c0_2] : memref<512x256xf32, #tpu.memory_space<vmem>>, vector<512x256xf32>
    %cst = arith.constant dense<0.000000e+00> : vector<8x256xf32>
    %2 = tpu.matmul %0, %1, %cst {dimension_numbers = #tpu.dot_dimension_numbers<[1], [0], [0], [1], [0, 0, 1, 1], [], []>} : vector<8x512xf32>, vector<512x256xf32>, vector<8x256xf32> -> vector<8x256xf32>
    %c0_3 = arith.constant 0 : index
    %c0_4 = arith.constant 0 : index
    %3 = vector.load %arg3[%c0_3, %c0_4] : memref<1x256xf32, #tpu.memory_space<vmem>>, vector<1x256xf32>
    %4 = vector.broadcast %3 : vector<1x256xf32> to vector<8x256xf32>
    %5 = arith.addf %2, %4 : vector<8x256xf32>
    %cst_5 = arith.constant 0.000000e+00 : f32
    %6 = vector.broadcast %cst_5 : f32 to vector<8x256xf32>
    %7 = arith.maximumf %5, %6 : vector<8x256xf32>
    %c0_6 = arith.constant 0 : index
    %c0_7 = arith.constant 0 : index
    %8 = vector.load %arg4[%c0_6, %c0_7] : memref<256x128xf32, #tpu.memory_space<vmem>>, vector<256x128xf32>
    %cst_8 = arith.constant dense<0.000000e+00> : vector<8x128xf32>
    %9 = tpu.matmul %7, %8, %cst_8 {dimension_numbers = #tpu.dot_dimension_numbers<[1], [0], [0], [1], [0, 0, 1, 1], [], []>} : vector<8x256xf32>, vector<256x128xf32>, vector<8x128xf32> -> vector<8x128xf32>
    %c0_9 = arith.constant 0 : index
    %c0_10 = arith.constant 0 : index
    %10 = vector.load %arg5[%c0_9, %c0_10] : memref<1x128xf32, #tpu.memory_space<vmem>>, vector<1x128xf32>
    %11 = vector.broadcast %10 : vector<1x128xf32> to vector<8x128xf32>
    %12 = arith.addf %9, %11 : vector<8x128xf32>
    %cst_11 = arith.constant 0.000000e+00 : f32
    %13 = vector.broadcast %cst_11 : f32 to vector<8x128xf32>
    %14 = arith.maximumf %12, %13 : vector<8x128xf32>
    %c0_12 = arith.constant 0 : index
    %c0_13 = arith.constant 0 : index
    %15 = vector.load %arg6[%c0_12, %c0_13] : memref<128x128xf32, #tpu.memory_space<vmem>>, vector<128x128xf32>
    %cst_14 = arith.constant dense<0.000000e+00> : vector<8x128xf32>
    %16 = tpu.matmul %14, %15, %cst_14 {dimension_numbers = #tpu.dot_dimension_numbers<[1], [0], [0], [1], [0, 0, 1, 1], [], []>} : vector<8x128xf32>, vector<128x128xf32>, vector<8x128xf32> -> vector<8x128xf32>
    %c0_15 = arith.constant 0 : index
    %c0_16 = arith.constant 0 : index
    %17 = vector.load %arg7[%c0_15, %c0_16] : memref<1x128xf32, #tpu.memory_space<vmem>>, vector<1x128xf32>
    %18 = vector.broadcast %17 : vector<1x128xf32> to vector<8x128xf32>
    %19 = arith.addf %16, %18 : vector<8x128xf32>
    %cst_17 = arith.constant 0.000000e+00 : f32
    %20 = vector.broadcast %cst_17 : f32 to vector<8x128xf32>
    %21 = arith.maximumf %19, %20 : vector<8x128xf32>
    %c0_18 = arith.constant 0 : index
    %c0_19 = arith.constant 0 : index
    %22 = vector.load %arg8[%c0_18, %c0_19] : memref<128x20xf32, #tpu.memory_space<vmem>>, vector<128x20xf32>
    %cst_20 = arith.constant dense<0.000000e+00> : vector<8x20xf32>
    %23 = tpu.matmul %21, %22, %cst_20 {dimension_numbers = #tpu.dot_dimension_numbers<[1], [0], [0], [1], [0, 0, 1, 1], [], []>} : vector<8x128xf32>, vector<128x20xf32>, vector<8x20xf32> -> vector<8x20xf32>
    %c0_21 = arith.constant 0 : index
    %c0_22 = arith.constant 0 : index
    %24 = vector.load %arg9[%c0_21, %c0_22] : memref<1x20xf32, #tpu.memory_space<vmem>>, vector<1x20xf32>
    %25 = vector.broadcast %24 : vector<1x20xf32> to vector<8x20xf32>
    %26 = arith.addf %23, %25 : vector<8x20xf32>
    %c0_23 = arith.constant 0 : index
    %c0_24 = arith.constant 0 : index
    %27 = vector.load %arg10[%c0_23, %c0_24] : memref<8x20xf32, #tpu.memory_space<vmem>>, vector<8x20xf32>
    tpu.vector_store %arg10[%c0_23, %c0_24], %26 {strides = array<i32>} : memref<8x20xf32, #tpu.memory_space<vmem>>, vector<8x20xf32>,
    return
  }
  func.func @transform_0(%arg0: i32) -> (i32, i32) {
    %c0_i32 = arith.constant 0 : i32
    %c0_i32_0 = arith.constant 0 : i32
    return %arg0, %c0_i32 : i32, i32
  }
  func.func @transform_1(%arg0: i32) -> (i32, i32) {
    %c0_i32 = arith.constant 0 : i32
    %c0_i32_0 = arith.constant 0 : i32
    %c0_i32_1 = arith.constant 0 : i32
    return %c0_i32, %c0_i32_0 : i32, i32
  }
  func.func @transform_2(%arg0: i32) -> (i32, i32) {
    %c0_i32 = arith.constant 0 : i32
    %c0_i32_0 = arith.constant 0 : i32
    %c0_i32_1 = arith.constant 0 : i32
    return %c0_i32, %c0_i32_0 : i32, i32
  }
  func.func @transform_3(%arg0: i32) -> (i32, i32) {
    %c0_i32 = arith.constant 0 : i32
    %c0_i32_0 = arith.constant 0 : i32
    %c0_i32_1 = arith.constant 0 : i32
    return %c0_i32, %c0_i32_0 : i32, i32
  }
  func.func @transform_4(%arg0: i32) -> (i32, i32) {
    %c0_i32 = arith.constant 0 : i32
    %c0_i32_0 = arith.constant 0 : i32
    %c0_i32_1 = arith.constant 0 : i32
    return %c0_i32, %c0_i32_0 : i32, i32
  }
  func.func @transform_5(%arg0: i32) -> (i32, i32) {
    %c0_i32 = arith.constant 0 : i32
    %c0_i32_0 = arith.constant 0 : i32
    %c0_i32_1 = arith.constant 0 : i32
    return %c0_i32, %c0_i32_0 : i32, i32
  }
  func.func @transform_6(%arg0: i32) -> (i32, i32) {
    %c0_i32 = arith.constant 0 : i32
    %c0_i32_0 = arith.constant 0 : i32
    %c0_i32_1 = arith.constant 0 : i32
    return %c0_i32, %c0_i32_0 : i32, i32
  }
  func.func @transform_7(%arg0: i32) -> (i32, i32) {
    %c0_i32 = arith.constant 0 : i32
    %c0_i32_0 = arith.constant 0 : i32
    %c0_i32_1 = arith.constant 0 : i32
    return %c0_i32, %c0_i32_0 : i32, i32
  }
  func.func @transform_8(%arg0: i32) -> (i32, i32) {
    %c0_i32 = arith.constant 0 : i32
    %c0_i32_0 = arith.constant 0 : i32
    %c0_i32_1 = arith.constant 0 : i32
    return %c0_i32, %c0_i32_0 : i32, i32
  }
  func.func @transform_9(%arg0: i32) -> (i32, i32) {
    %c0_i32 = arith.constant 0 : i32
    %c0_i32_0 = arith.constant 0 : i32
    return %arg0, %c0_i32 : i32, i32
  }
}

</mosaic_0001>

<bundles_post_ra>
// kernel: tpu_custom_call.1
= control target key start
LH: loop header
LB: loop body
LE: loop exit
PB: predicated region body
PF: predicated region fallthrough
CT: control target
= control target key end

     0   :  { %14 = vsyncpa [#allocation3], 0  ;;  %s1334_s0 = inlined_call_operand.vmem [shape: f32[8,512], index: 0, kind: input, shape index: {}]   ;;  %s1335_s1 = inlined_call_operand.hbm [shape: f32[512,256], index: 1, kind: input, shape index: {}]   ;;  %s1336_s2 = inlined_call_operand.vmem [shape: f32[1,256], index: 2, kind: input, shape index: {}]   ;;  %s1337_s3 = inlined_call_operand.hbm [shape: f32[256,128], index: 3, kind: input, shape index: {}]   ;;  %s1338_s4 = inlined_call_operand.vmem [shape: f32[1,128], index: 4, kind: input, shape index: {}]   ;;  %s1339_s5 = inlined_call_operand.vmem [shape: f32[128,128], index: 5, kind: input, shape index: {}]   ;;  %s1340_s6 = inlined_call_operand.vmem [shape: f32[1,128], index: 6, kind: input, shape index: {}]   ;;  %s1341_s7 = inlined_call_operand.vmem [shape: f32[128,20], index: 7, kind: input, shape index: {}]   ;;  %s1342_s8 = inlined_call_operand.vmem [shape: f32[1,20], index: 8, kind: input, shape index: {}]   ;;  %s1343_s9 = inlined_call_operand.hbm [shape: f32[8,20], index: 9, kind: output, shape index: {}]  }
   0x1   :  { %15 = vsyncpa [#allocation6], 0 }
   0x2   :  { %16 = vsyncpa [#allocation4], 0  ;;  %s1100_s30 = smov [#allocation2]   ;;  %s1028_s13 = scalar_lea.hbm %s1335_s1, 16384 }
   0x3   :  { %s24_s10 = sshll.u32 %s1100_s30, 4  ;;  %p1029_p0 = scmp.ne.s32.totalorder %s1335_s1, %s1028_s13  ;;  %s25_s10 = int_to_ptr.vmem [resolvable:$true] %s24_s10 }
   0x4   :  { %p1032_p1 = scmp.lt.u32.totalorder %s1028_s13, %s1335_s1 }
   0x6   :  { %p1034_p2 = pnand %p1032_p1, %p1029_p0 }
   0x8   :  { %1037 = shalt.err (!%p1034_p2)
}
   0x9   :  { %s1038_s18 = scalar_lea.vmem %s25_s10, 16384  ;;  %p1043_p4 = scmp.lt.s32.totalorder %s25_s10, %s25_s10 }
   0xa   :  { %p1039_p3 = scmp.ne.s32.totalorder %s25_s10, %s1038_s18  ;;  %p1044_p5 = scmp.lt.s32.totalorder %s1038_s18, %s1038_s18 }
   0xc   :  { %p1045_p6 = por %p1044_p5, %p1043_p4 }
   0xe   :  { %p1046_p7 = pnand %p1045_p6, %p1039_p3 }
  0x10   :  { %1049 = shalt.err (!%p1046_p7)
}
  0x11   :  { %s1101_s19 = smov 256   ;;  %s1102_s20 = smov 16  }
  0x12   :  { %30 = dma.hbm_to_vmem [thread:$0]  %s1335_s1, 16384, %s25_s10, [#allocation3], %s1101_s19, %s1101_s19, %s1102_s20  }
  0x13   :  { %s1103_s23 = smov [#allocation5]   ;;  %s1050_s27 = scalar_lea.hbm %s1337_s3, 4096 }
  0x14   :  { %s38_s24 = sshll.u32 %s1103_s23, 4  ;;  %p1051_p8 = scmp.ne.s32.totalorder %s1337_s3, %s1050_s27  ;;  %s39_s24 = int_to_ptr.vmem [resolvable:$true] %s38_s24 }
  0x15   :  { %p1054_p9 = scmp.lt.u32.totalorder %s1050_s27, %s1337_s3 }
  0x17   :  { %p1056_p10 = pnand %p1054_p9, %p1051_p8 }
  0x19   :  { %1059 = shalt.err (!%p1056_p10)
}
  0x1a   :  { %s1060_s12 = scalar_lea.vmem %s39_s24, 4096  ;;  %p1065_p12 = scmp.lt.s32.totalorder %s39_s24, %s39_s24 }
  0x1b   :  { %p1061_p11 = scmp.ne.s32.totalorder %s39_s24, %s1060_s12  ;;  %p1066_p13 = scmp.lt.s32.totalorder %s1060_s12, %s1060_s12 }
  0x1d   :  { %p1067_p0 = por %p1066_p13, %p1065_p12 }
  0x1f   :  { %p1068_p1 = pnand %p1067_p0, %p1061_p11 }
  0x21   :  { %1071 = shalt.err (!%p1068_p1)
}
  0x22   :  { %s1104_s1 = smov 128   ;;  %s1105_s10 = smov 8  }
  0x23   :  { %44 = dma.hbm_to_vmem [thread:$0]  %s1337_s3, 4096, %s39_s24, [#allocation6], %s1104_s1, %s1104_s1, %s1105_s10  }
  0x24   :  { %1094 = dma.done.wait [#allocation3], 16384  }
  0x25   :  { %1095 = vsyncadd [#allocation3], 4294950912 }
  0x26   :  { %1096 = dma.done.wait [#allocation6], 4096  }
  0x27   :  { %1097 = vsyncadd [#allocation6], 4294963200  ;;  %v66_v0 = vld [vmem:[#allocation2 + $0x8] sm:$0xff]  ;;  %v68_v1 = vld [vmem:[#allocation2 + $0x18] sm:$0xff]  ;;  %vm1107_vm0 = vmmov 0   ;;  %s1109_s15 = smov [#allocation7]  }
  0x28   :  { %v65_v2 = vld [vmem:[#allocation2] sm:$0xff]  ;;  %v806_v3 = vpack.c.bf16 %v68_v1, %v66_v0  ;;  %v67_v4 = vld [vmem:[#allocation2 + $0x10] sm:$0xff]  ;;  %v70_v5 = vld [vmem:[#allocation2 + $0x28] sm:$0xff]  ;;  %s654_s16 = sshll.u32 %s1109_s15, 4  ;;  %vm646_vm1 = vcmask 162816   ;;  %s655_s16 = int_to_ptr.vmem [resolvable:$true] %s654_s16 }
  0x29   :  { %v72_v6 = vld [vmem:[#allocation2 + $0x38] sm:$0xff]  ;;  %v808_v7 = vpack.c.bf16 %v67_v4, %v65_v2  ;;  %v69_v9 = vld [vmem:[#allocation2 + $0x20] sm:$0xff]  ;;  %v71_v10 = vld [vmem:[#allocation2 + $0x30] sm:$0xff]  ;;  %p1077_p3 = scmp.lt.s32.totalorder %s655_s16, %s655_s16 }
  0x2a   :  { %v810_v8 = vpack.c.bf16 %v72_v6, %v70_v5  ;;  %v74_v11 = vld [vmem:[#allocation2 + $0x48] sm:$0xff]  ;;  %807 = vmatprep.subr.bf16.mxu0 %v806_v3  ;;  %v76_v12 = vld [vmem:[#allocation2 + $0x58] sm:$0xff]  ;;  %v812_v13 = vpack.c.bf16 %v71_v10, %v69_v9  ;;  %v73_v15 = vld [vmem:[#allocation2 + $0x40] sm:$0xff] }
  0x2b   :  { %809 = vmatpush1.bf16.msra.mxu0 %v808_v7  ;;  %v814_v14 = vpack.c.bf16 %v76_v12, %v74_v11  ;;  %v75_v16 = vld [vmem:[#allocation2 + $0x50] sm:$0xff]  ;;  %v78_v17 = vld [vmem:[#allocation2 + $0x68] sm:$0xff]  ;;  %v80_v18 = vld [vmem:[#allocation2 + $0x78] sm:$0xff] }
  0x2c   :  { %811 = vmatprep.subr.bf16.mxu0 %v810_v8  ;;  %v816_v19 = vpack.c.bf16 %v75_v16, %v73_v15  ;;  %v818_v20 = vpack.c.bf16 %v80_v18, %v78_v17  ;;  %v77_v21 = vld [vmem:[#allocation2 + $0x60] sm:$0xff]  ;;  %v79_v22 = vld [vmem:[#allocation2 + $0x70] sm:$0xff]  ;;  %v82_v23 = vld [vmem:[#allocation2 + $0x88] sm:$0xff] }
  0x2d   :  { %v84_v24 = vld [vmem:[#allocation2 + $0x98] sm:$0xff]  ;;  %v820_v25 = vpack.c.bf16 %v79_v22, %v77_v21  ;;  %v81_v27 = vld [vmem:[#allocation2 + $0x80] sm:$0xff]  ;;  %v83_v28 = vld [vmem:[#allocation2 + $0x90] sm:$0xff] }
  0x2e   :  { %v822_v26 = vpack.c.bf16 %v84_v24, %v82_v23  ;;  %v86_v29 = vld [vmem:[#allocation2 + $0xa8] sm:$0xff]  ;;  %v88_v30 = vld [vmem:[#allocation2 + $0xb8] sm:$0xff]  ;;  %v824_v31 = vpack.c.bf16 %v83_v28, %v81_v27  ;;  %v85_v33 = vld [vmem:[#allocation2 + $0xa0] sm:$0xff] }
  0x2f   :  { %813 = vmatpush1.bf16.msra.mxu0 %v812_v13  ;;  %v826_v32 = vpack.c.bf16 %v88_v30, %v86_v29  ;;  %v87_v34 = vld [vmem:[#allocation2 + $0xb0] sm:$0xff]  ;;  %v90_v35 = vld [vmem:[#allocation2 + $0xc8] sm:$0xff]  ;;  %v92_v36 = vld [vmem:[#allocation2 + $0xd8] sm:$0xff] }
  0x30   :  { %815 = vmatprep.subr.bf16.mxu0 %v814_v14  ;;  %v828_v37 = vpack.c.bf16 %v87_v34, %v85_v33  ;;  %v830_v38 = vpack.c.bf16 %v92_v36, %v90_v35  ;;  %v89_v39 = vld [vmem:[#allocation2 + $0xc0] sm:$0xff]  ;;  %v91_v40 = vld [vmem:[#allocation2 + $0xd0] sm:$0xff]  ;;  %v62_v41 = vld [vmem:[%s1334_s0 + $0x8] sm:$0xff] }
  0x31   :  { %v94_v42 = vld [vmem:[#allocation2 + $0xe8] sm:$0xff]  ;;  %v96_v43 = vld [vmem:[#allocation2 + $0xf8] sm:$0xff]  ;;  %269 = vmatprep.mubr.f32.mxu0 %v62_v41  ;;  %v832_v44 = vpack.c.bf16 %v91_v40, %v89_v39  ;;  %v93_v46 = vld [vmem:[#allocation2 + $0xe0] sm:$0xff] }
  0x32   :  { %v834_v45 = vpack.c.bf16 %v96_v43, %v94_v42  ;;  %v95_v47 = vld [vmem:[#allocation2 + $0xf0] sm:$0xff]  ;;  %v98_v48 = vld [vmem:[#allocation2 + $0x108] sm:$0xff]  ;;  %v100_v49 = vld [vmem:[#allocation2 + $0x118] sm:$0xff] }
  0x33   :  { %817 = vmatpush1.bf16.msra.mxu0 %v816_v19  ;;  %v836_v50 = vpack.c.bf16 %v95_v47, %v93_v46  ;;  %v838_v51 = vpack.c.bf16 %v100_v49, %v98_v48  ;;  %v97_v52 = vld [vmem:[#allocation2 + $0x100] sm:$0xff]  ;;  %v99_v53 = vld [vmem:[#allocation2 + $0x110] sm:$0xff]  ;;  %v102_v54 = vld [vmem:[#allocation2 + $0x128] sm:$0xff] }
  0x34   :  { %819 = vmatprep.subr.bf16.mxu0 %v818_v20  ;;  %v104_v55 = vld [vmem:[#allocation2 + $0x138] sm:$0xff]  ;;  %v840_v56 = vpack.c.bf16 %v99_v53, %v97_v52  ;;  %v101_v58 = vld [vmem:[#allocation2 + $0x120] sm:$0xff]  ;;  %v103_v59 = vld [vmem:[#allocation2 + $0x130] sm:$0xff] }
  0x35   :  { %v842_v57 = vpack.c.bf16 %v104_v55, %v102_v54  ;;  %v106_v60 = vld [vmem:[#allocation2 + $0x148] sm:$0xff]  ;;  %v108_v61 = vld [vmem:[#allocation2 + $0x158] sm:$0xff]  ;;  %v844_v62 = vpack.c.bf16 %v103_v59, %v101_v58  ;;  %v105_v0 = vld [vmem:[#allocation2 + $0x140] sm:$0xff] }
  0x36   :  { %v846_v63 = vpack.c.bf16 %v108_v61, %v106_v60  ;;  %v107_v1 = vld [vmem:[#allocation2 + $0x150] sm:$0xff]  ;;  %v110_v2 = vld [vmem:[#allocation2 + $0x168] sm:$0xff]  ;;  %v112_v3 = vld [vmem:[#allocation2 + $0x178] sm:$0xff] }
  0x37   :  { %821 = vmatpush1.bf16.msra.mxu0 %v820_v25  ;;  %v848_v4 = vpack.c.bf16 %v107_v1, %v105_v0  ;;  %v850_v5 = vpack.c.bf16 %v112_v3, %v110_v2  ;;  %v109_v6 = vld [vmem:[#allocation2 + $0x160] sm:$0xff]  ;;  %v111_v7 = vld [vmem:[#allocation2 + $0x170] sm:$0xff]  ;;  %v114_v8 = vld [vmem:[#allocation2 + $0x188] sm:$0xff] }
  0x38   :  { %823 = vmatprep.subr.bf16.mxu0 %v822_v26  ;;  %v116_v9 = vld [vmem:[#allocation2 + $0x198] sm:$0xff]  ;;  %v113_v10 = vld [vmem:[#allocation2 + $0x180] sm:$0xff]  ;;  %v115_v11 = vld [vmem:[#allocation2 + $0x190] sm:$0xff]  ;;  %v852_v12 = vpack.c.bf16 %v111_v7, %v109_v6 }
  0x39   :  { %v118_v13 = vld [vmem:[#allocation2 + $0x1a8] sm:$0xff]  ;;  %v120_v14 = vld [vmem:[#allocation2 + $0x1b8] sm:$0xff]  ;;  %v365_v15 = vld [vmem:[#allocation5 + $0x80] sm:$0xff]  ;;  %v854_v18 = vpack.c.bf16 %v116_v9, %v114_v8  ;;  %v856_v29 = vpack.c.bf16 %v115_v11, %v113_v10 }
  0x3a   :  { %v366_v16 = vld [vmem:[#allocation5 + $0x88] sm:$0xff]  ;;  %v349_v17 = vld [vmem:[#allocation5] sm:$0xff]  ;;  %v367_v21 = vld [vmem:[#allocation5 + $0x90] sm:$0xff]  ;;  %v858_v33 = vpack.c.bf16 %v120_v14, %v118_v13 }
  0x3b   :  { %825 = vmatpush1.bf16.msra.mxu0 %v824_v31  ;;  %v934_v19 = vpack.c.bf16 %v366_v16, %v365_v15  ;;  %v350_v20 = vld [vmem:[#allocation5 + $0x8] sm:$0xff]  ;;  %v368_v22 = vld [vmem:[#allocation5 + $0x98] sm:$0xff]  ;;  %v351_v25 = vld [vmem:[#allocation5 + $0x10] sm:$0xff] }
  0x3c   :  { %827 = vmatprep.subr.bf16.mxu0 %v826_v32  ;;  %v936_v23 = vpack.c.bf16 %v350_v20, %v349_v17  ;;  %v938_v24 = vpack.c.bf16 %v368_v22, %v367_v21  ;;  %v352_v26 = vld [vmem:[#allocation5 + $0x18] sm:$0xff]  ;;  %v369_v27 = vld [vmem:[#allocation5 + $0xa0] sm:$0xff]  ;;  %v370_v28 = vld [vmem:[#allocation5 + $0xa8] sm:$0xff] }
  0x3d   :  { %935 = vmatprep.subr.bf16.mxu1 %v934_v19  ;;  %v117_v30 = vld [vmem:[#allocation2 + $0x1a0] sm:$0xff]  ;;  %v119_v31 = vld [vmem:[#allocation2 + $0x1b0] sm:$0xff]  ;;  %v940_v32 = vpack.c.bf16 %v352_v26, %v351_v25  ;;  %v122_v34 = vld [vmem:[#allocation2 + $0x1c8] sm:$0xff]  ;;  %v942_v35 = vpack.c.bf16 %v370_v28, %v369_v27 }
  0x3e   :  { %937 = vmatpush3.bf16.msra.mxu1 %v936_v23  ;;  %v353_v36 = vld [vmem:[#allocation5 + $0x20] sm:$0xff]  ;;  %v371_v39 = vld [vmem:[#allocation5 + $0xb0] sm:$0xff]  ;;  %v372_v40 = vld [vmem:[#allocation5 + $0xb8] sm:$0xff]  ;;  %v860_v41 = vpack.c.bf16 %v119_v31, %v117_v30 }
  0x3f   :  { %829 = vmatpush1.bf16.msra.mxu0 %v828_v37  ;;  %939 = vmatprep.subr.bf16.mxu1 %v938_v24  ;;  %v354_v37 = vld [vmem:[#allocation5 + $0x28] sm:$0xff]  ;;  %v121_v42 = vld [vmem:[#allocation2 + $0x1c0] sm:$0xff]  ;;  %v123_v43 = vld [vmem:[#allocation2 + $0x1d0] sm:$0xff]  ;;  %v946_v47 = vpack.c.bf16 %v372_v40, %v371_v39 }
  0x40   :  { %831 = vmatprep.subr.bf16.mxu0 %v830_v38  ;;  %v124_v38 = vld [vmem:[#allocation2 + $0x1d8] sm:$0xff]  ;;  %v126_v46 = vld [vmem:[#allocation2 + $0x1e8] sm:$0xff]  ;;  %v355_v48 = vld [vmem:[#allocation5 + $0x30] sm:$0xff]  ;;  %v864_v53 = vpack.c.bf16 %v123_v43, %v121_v42 }
  0x41   :  { %v356_v49 = vld [vmem:[#allocation5 + $0x38] sm:$0xff]  ;;  %v374_v52 = vld [vmem:[#allocation5 + $0xc8] sm:$0xff]  ;;  %v125_v54 = vld [vmem:[#allocation2 + $0x1e0] sm:$0xff] }
  0x42   :  { %941 = vmatpush3.bf16.msra.mxu1 %v940_v32  ;;  %v127_v55 = vld [vmem:[#allocation2 + $0x1f0] sm:$0xff]  ;;  %v130_v58 = vld [vmem:[#allocation2 + $0x208] sm:$0xff]  ;;  %v357_v60 = vld [vmem:[#allocation5 + $0x40] sm:$0xff] }
  0x43   :  { %833 = vmatpush1.bf16.msra.mxu0 %v832_v44  ;;  %v944_v44 = vpack.c.bf16 %v354_v37, %v353_v36  ;;  %943 = vmatprep.subr.bf16.mxu1 %v942_v35  ;;  %v358_v61 = vld [vmem:[#allocation5 + $0x48] sm:$0xff]  ;;  %v376_v0 = vld [vmem:[#allocation5 + $0xd8] sm:$0xff]  ;;  %v868_v1 = vpack.c.bf16 %v127_v55, %v125_v54  ;;  %v359_v9 = vld [vmem:[#allocation5 + $0x50] sm:$0xff] }
  0x44   :  { %835 = vmatprep.subr.bf16.mxu0 %v834_v45  ;;  %v862_v45 = vpack.c.bf16 %v124_v38, %v122_v34  ;;  %v952_v2 = vpack.c.bf16 %v358_v61, %v357_v60  ;;  %v134_v6 = vld [vmem:[#allocation2 + $0x228] sm:$0xff]  ;;  %v136_v8 = vld [vmem:[#allocation2 + $0x238] sm:$0xff]  ;;  %v377_v11 = vld [vmem:[#allocation5 + $0xe0] sm:$0xff] }
  0x45   :  { %v360_v10 = vld [vmem:[#allocation5 + $0x58] sm:$0xff]  ;;  %v61_v13 = vld [vmem:[%s1334_s0] sm:$0xff]  ;;  %v874_v15 = vpack.c.bf16 %v136_v8, %v134_v6  ;;  %v135_v17 = vld [vmem:[#allocation2 + $0x230] sm:$0xff] }
  0x46   :  { %945 = vmatpush3.bf16.msra.mxu1 %v944_v44  ;;  %v133_v16 = vld [vmem:[#allocation2 + $0x220] sm:$0xff]  ;;  %v956_v19 = vpack.c.bf16 %v360_v10, %v359_v9  ;;  %v138_v20 = vld [vmem:[#allocation2 + $0x248] sm:$0xff]  ;;  %v140_v21 = vld [vmem:[#allocation2 + $0x258] sm:$0xff] }
  0x47   :  { %837 = vmatpush1.bf16.msra.mxu0 %v836_v50  ;;  %v128_v50 = vld [vmem:[#allocation2 + $0x1f8] sm:$0xff]  ;;  %947 = vmatprep.subr.bf16.mxu1 %v946_v47  ;;  %v876_v23 = vpack.c.bf16 %v135_v17, %v133_v16  ;;  %v878_v24 = vpack.c.bf16 %v140_v21, %v138_v20  ;;  %v137_v25 = vld [vmem:[#allocation2 + $0x240] sm:$0xff]  ;;  %v139_v26 = vld [vmem:[#allocation2 + $0x250] sm:$0xff] }
  0x48   :  { %839 = vmatprep.subr.bf16.mxu0 %v838_v51  ;;  %v373_v51 = vld [vmem:[#allocation5 + $0xc0] sm:$0xff]  ;;  %v142_v27 = vld [vmem:[#allocation2 + $0x268] sm:$0xff]  ;;  %v144_v28 = vld [vmem:[#allocation2 + $0x278] sm:$0xff] }
  0x49   :  { %v950_v59 = vpack.c.bf16 %v374_v52, %v373_v51  ;;  %v882_v30 = vpack.c.bf16 %v144_v28, %v142_v27  ;;  %v141_v31 = vld [vmem:[#allocation2 + $0x260] sm:$0xff]  ;;  %v143_v32 = vld [vmem:[#allocation2 + $0x270] sm:$0xff]  ;;  %v148_v34 = vld [vmem:[#allocation2 + $0x298] sm:$0xff] }
  0x4a   :  { %v884_v35 = vpack.c.bf16 %v143_v32, %v141_v31  ;;  %v145_v37 = vld [vmem:[#allocation2 + $0x280] sm:$0xff]  ;;  %v147_v38 = vld [vmem:[#allocation2 + $0x290] sm:$0xff]  ;;  %v150_v39 = vld [vmem:[#allocation2 + $0x2a8] sm:$0xff] }
  0x4b   :  { %841 = vmatpush1.bf16.msra.mxu0 %v840_v56  ;;  %v948_v56 = vpack.c.bf16 %v356_v49, %v355_v48  ;;  %v152_v40 = vld [vmem:[#allocation2 + $0x2b8] sm:$0xff]  ;;  %v149_v43 = vld [vmem:[#allocation2 + $0x2a0] sm:$0xff]  ;;  %v151_v44 = vld [vmem:[#allocation2 + $0x2b0] sm:$0xff] }
  0x4c   :  { %843 = vmatprep.subr.bf16.mxu0 %v842_v57  ;;  %v866_v57 = vpack.c.bf16 %v128_v50, %v126_v46  ;;  %v890_v42 = vpack.c.bf16 %v152_v40, %v150_v39  ;;  %v156_v46 = vld [vmem:[#allocation2 + $0x2d8] sm:$0xff]  ;;  %v892_v47 = vpack.c.bf16 %v151_v44, %v149_v43  ;;  %v153_v49 = vld [vmem:[#allocation2 + $0x2c0] sm:$0xff]  ;;  %v155_v50 = vld [vmem:[#allocation2 + $0x2d0] sm:$0xff] }
  0x4d   :  { %949 = vmatpush3.bf16.msra.mxu1 %v948_v56  ;;  %v158_v51 = vld [vmem:[#allocation2 + $0x2e8] sm:$0xff]  ;;  %v160_v52 = vld [vmem:[#allocation2 + $0x2f8] sm:$0xff]  ;;  %v157_v55 = vld [vmem:[#allocation2 + $0x2e0] sm:$0xff] }
  0x4e   :  { %951 = vmatprep.subr.bf16.mxu1 %v950_v59  ;;  %v898_v54 = vpack.c.bf16 %v160_v52, %v158_v51  ;;  %v159_v56 = vld [vmem:[#allocation2 + $0x2f0] sm:$0xff]  ;;  %v161_v61 = vld [vmem:[#allocation2 + $0x300] sm:$0xff]  ;;  %v172_v6 = vld [vmem:[#allocation2 + $0x358] sm:$0xff]  ;;  %v1106_v52 = vmov 0.0|0.0  }
  0x4f   :  { %845 = vmatpush1.bf16.msra.mxu0 %v844_v62  ;;  %v132_v62 = vld [vmem:[#allocation2 + $0x218] sm:$0xff]  ;;  %v900_v59 = vpack.c.bf16 %v159_v56, %v157_v55  ;;  %v169_v9 = vld [vmem:[#allocation2 + $0x340] sm:$0xff]  ;;  %v171_v10 = vld [vmem:[#allocation2 + $0x350] sm:$0xff] }
  0x50   :  { %847 = vmatprep.subr.bf16.mxu0 %v846_v63  ;;  %v375_v63 = vld [vmem:[#allocation5 + $0xd0] sm:$0xff]  ;;  %v870_v3 = vpack.c.bf16 %v132_v62, %v130_v58  ;;  %v164_v58 = vld [vmem:[#allocation2 + $0x318] sm:$0xff]  ;;  %v178_v17 = vld [vmem:[#allocation2 + $0x388] sm:$0xff] }
  0x51   :  { %v954_v7 = vpack.c.bf16 %v376_v0, %v375_v63  ;;  %953 = vmatpush3.bf16.msra.mxu1 %v952_v2  ;;  %v163_v62 = vld [vmem:[#allocation2 + $0x310] sm:$0xff]  ;;  %v166_v63 = vld [vmem:[#allocation2 + $0x328] sm:$0xff]  ;;  %v168_v0 = vld [vmem:[#allocation2 + $0x338] sm:$0xff] }
  0x52   :  { %v906_v2 = vpack.c.bf16 %v168_v0, %v166_v63  ;;  %v175_v16 = vld [vmem:[#allocation2 + $0x370] sm:$0xff]  ;;  %v177_v21 = vld [vmem:[#allocation2 + $0x380] sm:$0xff]  ;;  %v362_v44 = vld [vmem:[#allocation5 + $0x68] sm:$0xff] }
  0x53   :  { %849 = vmatpush1.bf16.msra.mxu0 %v848_v4  ;;  %v129_v4 = vld [vmem:[#allocation2 + $0x200] sm:$0xff]  ;;  %955 = vmatprep.subr.bf16.mxu1 %v954_v7  ;;  %v183_v28 = vld [vmem:[#allocation2 + $0x3b0] sm:$0xff]  ;;  %v460_v0 = vld [vmem:[%s1339_s5 + $0x8] sm:$0xff] }
  0x54   :  { %851 = vmatprep.subr.bf16.mxu0 %v850_v5  ;;  %v131_v5 = vld [vmem:[#allocation2 + $0x210] sm:$0xff]  ;;  %v181_v27 = vld [vmem:[#allocation2 + $0x3a0] sm:$0xff] }
  0x55   :  { %v872_v14 = vpack.c.bf16 %v131_v5, %v129_v4  ;;  %957 = vmatpush3.bf16.msra.mxu1 %v956_v19  ;;  %v167_v4 = vld [vmem:[#allocation2 + $0x330] sm:$0xff]  ;;  %v170_v5 = vld [vmem:[#allocation2 + $0x348] sm:$0xff]  ;;  %v924_v31 = vpack.c.bf16 %v183_v28, %v181_v27  ;;  %v189_v39 = vld [vmem:[#allocation2 + $0x3e0] sm:$0xff] }
  0x56   :  { %v910_v8 = vpack.c.bf16 %v172_v6, %v170_v5  ;;  %v191_v40 = vld [vmem:[#allocation2 + $0x3f0] sm:$0xff]  ;;  %v361_v43 = vld [vmem:[#allocation5 + $0x60] sm:$0xff]  ;;  %v462_v6 = vld [vmem:[%s1339_s5 + $0x18] sm:$0xff] }
  0x57   :  { %853 = vmatpush1.bf16.msra.mxu0 %v852_v12  ;;  %v378_v12 = vld [vmem:[#allocation5 + $0xe8] sm:$0xff]  ;;  %v193_v56 = vld [vmem:[%s1336_s2] sm:$0x3]  ;;  %v461_v5 = vld [vmem:[%s1339_s5 + $0x10] sm:$0xff] }
  0x58   :  { %855 = vmatprep.subr.bf16.mxu0 %v854_v18  ;;  %v64_v18 = vld [vmem:[%s1334_s0 + $0x18] sm:$0xff]  ;;  %v958_v22 = vpack.c.bf16 %v378_v12, %v377_v11  ;;  %v174_v11 = vld [vmem:[#allocation2 + $0x368] sm:$0xff]  ;;  %v459_v63 = vld [vmem:[%s1339_s5] sm:$0xff] }
  0x59   :  { %v176_v12 = vld [vmem:[#allocation2 + $0x378] sm:$0xff]  ;;  %v664_v28 = vld [vmem:[%s1338_s4] ss:$0 sm:$0xff] }
  0x5a   :  { %959 = vmatprep.subr.bf16.mxu1 %v958_v22  ;;  %v179_v22 = vld [vmem:[#allocation2 + $0x390] sm:$0xff] }
  0x5b   :  { %857 = vmatpush1.bf16.msra.mxu0 %v856_v29  ;;  %v880_v29 = vpack.c.bf16 %v139_v26, %v137_v25  ;;  %v920_v25 = vpack.c.bf16 %v179_v22, %v177_v21  ;;  %v472_v21 = vld [vmem:[%s1339_s5 + $0x68] sm:$0xff] }
  0x5c   :  { %859 = vmatprep.subr.bf16.mxu0 %v858_v33  ;;  %v146_v33 = vld [vmem:[#allocation2 + $0x288] sm:$0xff] }
  0x5d   :  { %v886_v36 = vpack.c.bf16 %v148_v34, %v146_v33  ;;  %v185_v33 = vld [vmem:[#allocation2 + $0x3c0] sm:$0xff]  ;;  %v187_v34 = vld [vmem:[#allocation2 + $0x3d0] sm:$0xff] }
  0x5f   :  { %861 = vmatpush1.bf16.msra.mxu0 %v860_v41  ;;  %v888_v41 = vpack.c.bf16 %v147_v38, %v145_v37  ;;  %v928_v37 = vpack.c.bf16 %v187_v34, %v185_v33 }
  0x60   :  { %863 = vmatprep.subr.bf16.mxu0 %v862_v45  ;;  %v154_v45 = vld [vmem:[#allocation2 + $0x2c8] sm:$0xff] }
  0x61   :  { %v894_v48 = vpack.c.bf16 %v156_v46, %v154_v45  ;;  %v960_v45 = vpack.c.bf16 %v362_v44, %v361_v43  ;;  %v379_v46 = vld [vmem:[#allocation5 + $0xf0] sm:$0xff]  ;;  %v560_v43 = vld [vmem:[%s1341_s7 + $0x38] sm:$0xff] }
  0x63   :  { %865 = vmatpush1.bf16.msra.mxu0 %v864_v53  ;;  %v896_v53 = vpack.c.bf16 %v155_v50, %v153_v49  ;;  %961 = vmatpush3.bf16.msra.mxu1 %v960_v45  ;;  %v363_v49 = vld [vmem:[#allocation5 + $0x70] sm:$0xff]  ;;  %v364_v50 = vld [vmem:[#allocation5 + $0x78] sm:$0xff]  ;;  %v561_v45 = vld [vmem:[%s1341_s7 + $0x40] sm:$0xff] }
  0x64   :  { %867 = vmatprep.subr.bf16.mxu0 %v866_v57  ;;  %v162_v57 = vld [vmem:[#allocation2 + $0x308] sm:$0xff]  ;;  %v964_v51 = vpack.c.bf16 %v364_v50, %v363_v49  ;;  %v564_v49 = vld [vmem:[%s1341_s7 + $0x58] sm:$0xff] }
  0x65   :  { %v902_v60 = vpack.c.bf16 %v164_v58, %v162_v57 }
  0x67   :  { %869 = vmatpush1.bf16.msra.mxu0 %v868_v1  ;;  %v904_v1 = vpack.c.bf16 %v163_v62, %v161_v61 }
  0x68   :  { %871 = vmatprep.subr.bf16.mxu0 %v870_v3  ;;  %v165_v3 = vld [vmem:[#allocation2 + $0x320] sm:$0xff] }
  0x69   :  { %v908_v7 = vpack.c.bf16 %v167_v4, %v165_v3  ;;  %v967_v3 = vpack.c.bf16 %v460_v0, %v459_v63 }
  0x6a   :  { %270 = vmatmul.mubr.f32.vlgmr.msra.gmra.mrb[0].mxu0 %v61_v13  ;;  %v912_v13 = vpack.c.bf16 %v171_v10, %v169_v9  ;;  %v464_v9 = vld [vmem:[%s1339_s5 + $0x28] sm:$0xff] }
  0x6b   :  { %873 = vmatpush1.bf16.msra.mxu0 %v872_v14  ;;  %340 = vmatprep.mubr.f32.mxu0 %v64_v18  ;;  %v914_v14 = vpack.c.bf16 %v176_v12, %v174_v11  ;;  %v180_v18 = vld [vmem:[#allocation2 + $0x398] sm:$0xff]  ;;  %v465_v11 = vld [vmem:[%s1339_s5 + $0x30] sm:$0xff] }
  0x6c   :  { %875 = vmatprep.subr.bf16.mxu0 %v874_v15  ;;  %v173_v15 = vld [vmem:[#allocation2 + $0x360] sm:$0xff]  ;;  %v918_v20 = vpack.c.bf16 %v180_v18, %v178_v17  ;;  %v466_v12 = vld [vmem:[%s1339_s5 + $0x38] sm:$0xff]  ;;  %v469_v17 = vld [vmem:[%s1339_s5 + $0x50] sm:$0xff] }
  0x6d   :  { %v916_v19 = vpack.c.bf16 %v175_v16, %v173_v15  ;;  %v468_v15 = vld [vmem:[%s1339_s5 + $0x48] sm:$0xff]  ;;  %v470_v18 = vld [vmem:[%s1339_s5 + $0x58] sm:$0xff] }
  0x6f   :  { %877 = vmatpush1.bf16.msra.mxu0 %v876_v23  ;;  %v182_v23 = vld [vmem:[#allocation2 + $0x3a8] sm:$0xff] }
  0x70   :  { %879 = vmatprep.subr.bf16.mxu0 %v878_v24  ;;  %v184_v24 = vld [vmem:[#allocation2 + $0x3b8] sm:$0xff] }
  0x71   :  { %v922_v26 = vpack.c.bf16 %v184_v24, %v182_v23  ;;  %v473_v23 = vld [vmem:[%s1339_s5 + $0x70] sm:$0xff]  ;;  %v474_v24 = vld [vmem:[%s1339_s5 + $0x78] sm:$0xff] }
  0x73   :  { %881 = vmatpush1.bf16.msra.mxu0 %v880_v29  ;;  %v186_v29 = vld [vmem:[#allocation2 + $0x3c8] sm:$0xff] }
  0x74   :  { %883 = vmatprep.subr.bf16.mxu0 %v882_v30  ;;  %v188_v30 = vld [vmem:[#allocation2 + $0x3d8] sm:$0xff] }
  0x75   :  { %v926_v32 = vpack.c.bf16 %v188_v30, %v186_v29 }
  0x77   :  { %885 = vmatpush1.bf16.msra.mxu0 %v884_v35  ;;  %v190_v35 = vld [vmem:[#allocation2 + $0x3e8] sm:$0xff] }
  0x78   :  { %887 = vmatprep.subr.bf16.mxu0 %v886_v36  ;;  %v192_v36 = vld [vmem:[#allocation2 + $0x3f8] sm:$0xff] }
  0x79   :  { %v930_v38 = vpack.c.bf16 %v192_v36, %v190_v35  ;;  %v555_v36 = vld [vmem:[%s1341_s7 + $0x10] sm:$0xff] }
  0x7b   :  { %889 = vmatpush1.bf16.msra.mxu0 %v888_v41  ;;  %v932_v41 = vpack.c.bf16 %v191_v40, %v189_v39  ;;  %v557_v39 = vld [vmem:[%s1341_s7 + $0x20] sm:$0xff]  ;;  %v558_v40 = vld [vmem:[%s1341_s7 + $0x28] sm:$0xff] }
  0x7c   :  { %891 = vmatprep.subr.bf16.mxu0 %v890_v42  ;;  %v63_v42 = vld [vmem:[%s1334_s0 + $0x10] sm:$0xff] }
  0x7f   :  { %893 = vmatpush1.bf16.msra.mxu0 %v892_v47  ;;  %v380_v47 = vld [vmem:[#allocation5 + $0xf8] sm:$0xff] }
  0x80   :  { %895 = vmatprep.subr.bf16.mxu0 %v894_v48  ;;  %v962_v48 = vpack.c.bf16 %v380_v47, %v379_v46  ;;  %v562_v46 = vld [vmem:[%s1341_s7 + $0x48] sm:$0xff] }
  0x81   :  { %v1003_v47 = vpack.c.bf16 %v562_v46, %v561_v45 }
  0x82   :  { %963 = vmatprep.subr.bf16.mxu1 %v962_v48  ;;  %v563_v48 = vld [vmem:[%s1341_s7 + $0x50] sm:$0xff] }
  0x83   :  { %897 = vmatpush1.bf16.msra.mxu0 %v896_v53  ;;  %965 = vmatpush3.bf16.msra.mxu1 %v964_v51  ;;  %v195_v53 = vlaneseq  ;;  %v1006_v50 = vpack.c.bf16 %v564_v49, %v563_v48  ;;  %v565_v51 = vld [vmem:[%s1341_s7 + $0x60] sm:$0xff] }
  0x84   :  { %899 = vmatprep.subr.bf16.mxu0 %v898_v54  ;;  %966 = vmatprep.subr.bf16.mxu1 %v1106_v52 }
  0x85   :  { %v196_v54 = vshrl.u32 %v195_v53, 7  ;;  %v566_v53 = vld [vmem:[%s1341_s7 + $0x68] sm:$0xff] }
  0x87   :  { %901 = vmatpush1.bf16.msra.mxu0 %v900_v59  ;;  %v197_v55 = vsub.s32 0, %v196_v54  ;;  %v201_v57 = vsub.s32 1, %v196_v54  ;;  %v1009_v54 = vpack.c.bf16 %v566_v53, %v565_v51 }
  0x88   :  { %903 = vmatprep.subr.bf16.mxu0 %v902_v60 }
  0x89   :  { %v198_v58 = vrot.slane %v193_v56, %v197_v55  ;;  %v202_v59 = vrot.slane %v193_v56, %v201_v57  ;;  %v567_v55 = vld [vmem:[%s1341_s7 + $0x70] sm:$0xff]  ;;  %v568_v56 = vld [vmem:[%s1341_s7 + $0x78] sm:$0xff] }
  0x8a   :  { %v1012_v57 = vpack.c.bf16 %v568_v56, %v567_v55 }
  0x8b   :  { %905 = vmatpush1.bf16.msra.mxu0 %v904_v1 }
  0x8c   :  { %907 = vmatprep.subr.bf16.mxu0 %v906_v2 }
  0x8f   :  { %909 = vmatpush1.bf16.msra.mxu0 %v908_v7  ;;  %v970_v7 = vpack.c.bf16 %v462_v6, %v461_v5 }
  0x90   :  { %911 = vmatprep.subr.bf16.mxu0 %v910_v8  ;;  %v463_v8 = vld [vmem:[%s1339_s5 + $0x20] sm:$0xff] }
  0x91   :  { %v973_v10 = vpack.c.bf16 %v464_v9, %v463_v8 }
  0x93   :  { %913 = vmatpush1.bf16.msra.mxu0 %v912_v13  ;;  %v976_v13 = vpack.c.bf16 %v466_v12, %v465_v11 }
  0x94   :  { %915 = vmatprep.subr.bf16.mxu0 %v914_v14  ;;  %v467_v14 = vld [vmem:[%s1339_s5 + $0x40] sm:$0xff] }
  0x95   :  { %v979_v16 = vpack.c.bf16 %v468_v15, %v467_v14 }
  0x97   :  { %917 = vmatpush1.bf16.msra.mxu0 %v916_v19  ;;  %v982_v19 = vpack.c.bf16 %v470_v18, %v469_v17 }
  0x98   :  { %919 = vmatprep.subr.bf16.mxu0 %v918_v20  ;;  %v471_v20 = vld [vmem:[%s1339_s5 + $0x60] sm:$0xff] }
  0x99   :  { %v985_v22 = vpack.c.bf16 %v472_v21, %v471_v20 }
  0x9b   :  { %921 = vmatpush1.bf16.msra.mxu0 %v920_v25  ;;  %v988_v25 = vpack.c.bf16 %v474_v24, %v473_v23 }
  0x9c   :  { %923 = vmatprep.subr.bf16.mxu0 %v922_v26  ;;  %v1108_v26 = vmov 0.0  }
  0x9f   :  { %925 = vmatpush1.bf16.msra.mxu0 %v924_v31  ;;  %v553_v31 = vld [vmem:[%s1341_s7] sm:$0xff] }
  0xa0   :  { %927 = vmatprep.subr.bf16.mxu0 %v926_v32  ;;  %v554_v32 = vld [vmem:[%s1341_s7 + $0x8] sm:$0xff] }
  0xa1   :  { %v991_v34 = vpack.c.bf16 %v554_v32, %v553_v31 }
  0xa3   :  { %929 = vmatpush1.bf16.msra.mxu0 %v928_v37  ;;  %v556_v37 = vld [vmem:[%s1341_s7 + $0x18] sm:$0xff] }
  0xa4   :  { %931 = vmatprep.subr.bf16.mxu0 %v930_v38  ;;  %v994_v38 = vpack.c.bf16 %v556_v37, %v555_v36 }
  0xa7   :  { %933 = vmatpush1.bf16.msra.mxu0 %v932_v41  ;;  %v997_v41 = vpack.c.bf16 %v558_v40, %v557_v39 }
  0xaa   :  { %341 = vmatmul.mubr.f32.vlgmr.msra.gmra.mrb[0].mxu0 %v63_v42  ;;  %v559_v42 = vld [vmem:[%s1341_s7 + $0x30] sm:$0xff]  ;;  %s1072_s7 = scalar_lea.vmem %s655_s16, 128 }
  0xab   :  { %v1000_v44 = vpack.c.bf16 %v560_v43, %v559_v42  ;;  %p1073_p2 = scmp.ne.s32.totalorder %s655_s16, %s1072_s7  ;;  %p1078_p4 = scmp.lt.s32.totalorder %s1072_s7, %s1072_s7 }
  0xad   :  { %p1079_p5 = por %p1078_p4, %p1077_p3 }
  0xaf   :  { %p1080_p6 = pnand %p1079_p5, %p1073_p2 }
 0x17d   :  { %v342_v60 = vpop.f32.mrb[0].mxu0 }
 0x17e   :  { %v1014_v61 = vadd.f32 %v342_v60, %v198_v58  ;;  %v344_v62 = vpop.f32.mrb[1].mxu0  ;;  %v665_v58 = vld [vmem:[%s1340_s6] ss:$0 sm:$0xff] }
 0x17f   :  { %v1015_v1 = vadd.f32 %v344_v62, %v202_v59 }
 0x180   :  { %v347_v4 = vmax.f32 %v1014_v61, 0.0 }
 0x181   :  { %v348_v2 = vmax.f32 %v1015_v1, 0.0 }
 0x183   :  { %452 = vmatprep.mubr.f32.mxu1 %v348_v2 }
 0x184   :  { %453 = vmatmul.mubr.f32.vlgmr.msra.gmra.mrb[0].mxu1 %v347_v4 }
 0x185   :  { %968 = vmatpush3.bf16.msra.mxu1 %v967_v3  ;;  %768 = vmatprep.mubr.msk.f32.mxu1 %vm1107_vm0, %v1108_v26 }
 0x186   :  { %969 = vmatprep.subr.bf16.mxu1 %v1106_v52 }
 0x189   :  { %971 = vmatpush3.bf16.msra.mxu1 %v970_v7 }
 0x18a   :  { %972 = vmatprep.subr.bf16.mxu1 %v1106_v52 }
 0x18d   :  { %974 = vmatpush3.bf16.msra.mxu1 %v973_v10 }
 0x18e   :  { %975 = vmatprep.subr.bf16.mxu1 %v1106_v52 }
 0x191   :  { %977 = vmatpush3.bf16.msra.mxu1 %v976_v13 }
 0x192   :  { %978 = vmatprep.subr.bf16.mxu1 %v1106_v52 }
 0x195   :  { %980 = vmatpush3.bf16.msra.mxu1 %v979_v16 }
 0x196   :  { %981 = vmatprep.subr.bf16.mxu1 %v1106_v52 }
 0x199   :  { %983 = vmatpush3.bf16.msra.mxu1 %v982_v19 }
 0x19a   :  { %984 = vmatprep.subr.bf16.mxu1 %v1106_v52 }
 0x19d   :  { %986 = vmatpush3.bf16.msra.mxu1 %v985_v22 }
 0x19e   :  { %987 = vmatprep.subr.bf16.mxu1 %v1106_v52 }
 0x1a1   :  { %989 = vmatpush3.bf16.msra.mxu1 %v988_v25 }
 0x1a2   :  { %990 = vmatprep.subr.bf16.mxu1 %v1106_v52 }
 0x257   :  { %v699_v27 = vpop.f32.mrb[0].mxu1 }
 0x258   :  { %v700_v29 = vpop.f32.mrb[1].mxu1 }
 0x259   :  { %v701_v30 = vadd.f32 %v700_v29, %v699_v27 }
 0x25b   :  { %v455_v33 = vadd.f32 %v701_v30, %v664_v28 }
 0x25d   :  { %v458_v35 = vmax.f32 %v455_v33, 0.0 }
 0x25f   :  { %769 = vmatmul.mubr.f32.vlgmr.msra.gmra.mrb[2].mxu1 %v458_v35 }
 0x260   :  { %992 = vmatpush3.bf16.msra.mxu1 %v991_v34  ;;  %803 = vmatprep.mubr.msk.f32.mxu1 %vm1107_vm0, %v1108_v26 }
 0x261   :  { %993 = vmatprep.subr.bf16.mxu1 %v1106_v52 }
 0x264   :  { %995 = vmatpush3.bf16.msra.mxu1 %v994_v38 }
 0x265   :  { %996 = vmatprep.subr.bf16.mxu1 %v1106_v52 }
 0x268   :  { %998 = vmatpush3.bf16.msra.mxu1 %v997_v41 }
 0x269   :  { %999 = vmatprep.subr.bf16.mxu1 %v1106_v52 }
 0x26c   :  { %1001 = vmatpush3.bf16.msra.mxu1 %v1000_v44 }
 0x26d   :  { %1002 = vmatprep.subr.bf16.mxu1 %v1106_v52 }
 0x270   :  { %1004 = vmatpush3.bf16.msra.mxu1 %v1003_v47 }
 0x271   :  { %1005 = vmatprep.subr.bf16.mxu1 %v1106_v52 }
 0x274   :  { %1007 = vmatpush3.bf16.msra.mxu1 %v1006_v50 }
 0x275   :  { %1008 = vmatprep.subr.bf16.mxu1 %v1106_v52 }
 0x278   :  { %1010 = vmatpush3.bf16.msra.mxu1 %v1009_v54 }
 0x279   :  { %1011 = vmatprep.subr.bf16.mxu1 %v1106_v52  ;;  %v666_v52 = vld [vmem:[%s1342_s8] ss:$0 sm:$0xff] }
 0x27c   :  { %1013 = vmatpush3.bf16.msra.mxu1 %v1012_v57 }
 0x332   :  { %v548_v59 = vpop.f32.mrb[2].mxu1 }
 0x333   :  { %v549_v60 = vadd.f32 %v665_v58, %v548_v59  ;;  %v770_v61 = vpop.f32.mrb[3].mxu1 }
 0x335   :  { %v552_v62 = vmax.f32 %v549_v60, 0.0 }
 0x337   :  { %804 = vmatmul.mubr.f32.vlgmr.msra.gmra.mrb[4].mxu1 %v552_v62 }
 0x40a   :  { %v642_v63 = vpop.f32.mrb[4].mxu1 }
 0x40b   :  { %v643_v0 = vadd.f32 %v666_v52, %v642_v63  ;;  %v805_v1 = vpop.f32.mrb[5].mxu1 }
 0x40d   :  { %647 = vst.msk [vmem:[#allocation7] sm:$0xff] %vm646_vm1, %v643_v0 }
 0x40e   :  { %1083 = shalt.err (!%p1080_p6)
}
 0x40f   :  { %s1084_s18 = scalar_lea.hbm %s1343_s9, 128 }
 0x410   :  { %p1085_p7 = scmp.ne.s32.totalorder %s1343_s9, %s1084_s18  ;;  %p1088_p8 = scmp.lt.u32.totalorder %s1084_s18, %s1343_s9 }
 0x412   :  { %p1090_p9 = pnand %p1088_p8, %p1085_p7 }
 0x414   :  { %1093 = shalt.err (!%p1090_p9)
}
 0x415   :  { %657 = dma.vmem_to_hbm [thread:$0]  %s655_s16, 128, %s1343_s9, [#allocation4]  }
 0x416   :  { %1098 = dma.done.wait [#allocation4], 128  }
 0x417   :  { %1099 = vsyncadd [#allocation4], 4294967168 }
 0x418   :  { %661 = vsyncpa [#allocation3], 1 }
 0x419   :  { %662 = vsyncpa [#allocation6], 1 }
 0x41a   :  { %663 = vsyncpa [#allocation4], 1 }

// kernel: tpu_custom_call.1
= control target key start
LH: loop header
LB: loop body
LE: loop exit
PB: predicated region body
PF: predicated region fallthrough
CT: control target
= control target key end

     0   :  { %14 = vsyncpa [#allocation3], 0  ;;  %s1334_s0 = inlined_call_operand.vmem [shape: f32[8,512], index: 0, kind: input, shape index: {}]   ;;  %s1335_s1 = inlined_call_operand.hbm [shape: f32[512,256], index: 1, kind: input, shape index: {}]   ;;  %s1336_s2 = inlined_call_operand.vmem [shape: f32[1,256], index: 2, kind: input, shape index: {}]   ;;  %s1337_s3 = inlined_call_operand.hbm [shape: f32[256,128], index: 3, kind: input, shape index: {}]   ;;  %s1338_s4 = inlined_call_operand.vmem [shape: f32[1,128], index: 4, kind: input, shape index: {}]   ;;  %s1339_s5 = inlined_call_operand.vmem [shape: f32[128,128], index: 5, kind: input, shape index: {}]   ;;  %s1340_s6 = inlined_call_operand.vmem [shape: f32[1,128], index: 6, kind: input, shape index: {}]   ;;  %s1341_s7 = inlined_call_operand.vmem [shape: f32[128,20], index: 7, kind: input, shape index: {}]   ;;  %s1342_s8 = inlined_call_operand.vmem [shape: f32[1,20], index: 8, kind: input, shape index: {}]   ;;  %s1343_s9 = inlined_call_operand.hbm [shape: f32[8,20], index: 9, kind: output, shape index: {}]  }
   0x1   :  { %15 = vsyncpa [#allocation6], 0 }
   0x2   :  { %16 = vsyncpa [#allocation4], 0  ;;  %s1100_s30 = smov [#allocation2]   ;;  %s1028_s13 = scalar_lea.hbm %s1335_s1, 16384 }
   0x3   :  { %s24_s10 = sshll.u32 %s1100_s30, 4  ;;  %p1029_p0 = scmp.ne.s32.totalorder %s1335_s1, %s1028_s13  ;;  %s25_s10 = int_to_ptr.vmem [resolvable:$true] %s24_s10 }
   0x4   :  { %p1032_p1 = scmp.lt.u32.totalorder %s1028_s13, %s1335_s1 }
   0x6   :  { %p1034_p2 = pnand %p1032_p1, %p1029_p0 }
   0x8   :  { %1037 = shalt.err (!%p1034_p2)
}
   0x9   :  { %s1038_s18 = scalar_lea.vmem %s25_s10, 16384  ;;  %p1043_p4 = scmp.lt.s32.totalorder %s25_s10, %s25_s10 }
   0xa   :  { %p1039_p3 = scmp.ne.s32.totalorder %s25_s10, %s1038_s18  ;;  %p1044_p5 = scmp.lt.s32.totalorder %s1038_s18, %s1038_s18 }
   0xc   :  { %p1045_p6 = por %p1044_p5, %p1043_p4 }
   0xe   :  { %p1046_p7 = pnand %p1045_p6, %p1039_p3 }
  0x10   :  { %1049 = shalt.err (!%p1046_p7)
}
  0x11   :  { %s1101_s19 = smov 256   ;;  %s1102_s20 = smov 16  }
  0x12   :  { %30 = dma.hbm_to_vmem [thread:$0]  %s1335_s1, 16384, %s25_s10, [#allocation3], %s1101_s19, %s1101_s19, %s1102_s20  }
  0x13   :  { %s1103_s23 = smov [#allocation5]   ;;  %s1050_s27 = scalar_lea.hbm %s1337_s3, 4096 }
  0x14   :  { %s38_s24 = sshll.u32 %s1103_s23, 4  ;;  %p1051_p8 = scmp.ne.s32.totalorder %s1337_s3, %s1050_s27  ;;  %s39_s24 = int_to_ptr.vmem [resolvable:$true] %s38_s24 }
  0x15   :  { %p1054_p9 = scmp.lt.u32.totalorder %s1050_s27, %s1337_s3 }
  0x17   :  { %p1056_p10 = pnand %p1054_p9, %p1051_p8 }
  0x19   :  { %1059 = shalt.err (!%p1056_p10)
}
  0x1a   :  { %s1060_s12 = scalar_lea.vmem %s39_s24, 4096  ;;  %p1065_p12 = scmp.lt.s32.totalorder %s39_s24, %s39_s24 }
  0x1b   :  { %p1061_p11 = scmp.ne.s32.totalorder %s39_s24, %s1060_s12  ;;  %p1066_p13 = scmp.lt.s32.totalorder %s1060_s12, %s1060_s12 }
  0x1d   :  { %p1067_p0 = por %p1066_p13, %p1065_p12 }
  0x1f   :  { %p1068_p1 = pnand %p1067_p0, %p1061_p11 }
  0x21   :  { %1071 = shalt.err (!%p1068_p1)
}
  0x22   :  { %s1104_s1 = smov 128   ;;  %s1105_s10 = smov 8  }
  0x23   :  { %44 = dma.hbm_to_vmem [thread:$0]  %s1337_s3, 4096, %s39_s24, [#allocation6], %s1104_s1, %s1104_s1, %s1105_s10  }
  0x24   :  { %1094 = dma.done.wait [#allocation3], 16384  }
  0x25   :  { %1095 = vsyncadd [#allocation3], 4294950912 }
  0x26   :  { %1096 = dma.done.wait [#allocation6], 4096  }
  0x27   :  { %1097 = vsyncadd [#allocation6], 4294963200  ;;  %v66_v0 = vld [vmem:[#allocation2 + $0x8] sm:$0xff]  ;;  %v68_v1 = vld [vmem:[#allocation2 + $0x18] sm:$0xff]  ;;  %vm1107_vm0 = vmmov 0   ;;  %s1109_s15 = smov [#allocation7]  }
  0x28   :  { %v65_v2 = vld [vmem:[#allocation2] sm:$0xff]  ;;  %v806_v3 = vpack.c.bf16 %v68_v1, %v66_v0  ;;  %v67_v4 = vld [vmem:[#allocation2 + $0x10] sm:$0xff]  ;;  %v70_v5 = vld [vmem:[#allocation2 + $0x28] sm:$0xff]  ;;  %s654_s16 = sshll.u32 %s1109_s15, 4  ;;  %vm646_vm1 = vcmask 162816   ;;  %s655_s16 = int_to_ptr.vmem [resolvable:$true] %s654_s16 }
  0x29   :  { %v72_v6 = vld [vmem:[#allocation2 + $0x38] sm:$0xff]  ;;  %v808_v7 = vpack.c.bf16 %v67_v4, %v65_v2  ;;  %v69_v9 = vld [vmem:[#allocation2 + $0x20] sm:$0xff]  ;;  %v71_v10 = vld [vmem:[#allocation2 + $0x30] sm:$0xff]  ;;  %p1077_p3 = scmp.lt.s32.totalorder %s655_s16, %s655_s16 }
  0x2a   :  { %v810_v8 = vpack.c.bf16 %v72_v6, %v70_v5  ;;  %v74_v11 = vld [vmem:[#allocation2 + $0x48] sm:$0xff]  ;;  %807 = vmatprep.subr.bf16.mxu0 %v806_v3  ;;  %v76_v12 = vld [vmem:[#allocation2 + $0x58] sm:$0xff]  ;;  %v812_v13 = vpack.c.bf16 %v71_v10, %v69_v9  ;;  %v73_v15 = vld [vmem:[#allocation2 + $0x40] sm:$0xff] }
  0x2b   :  { %809 = vmatpush1.bf16.msra.mxu0 %v808_v7  ;;  %v814_v14 = vpack.c.bf16 %v76_v12, %v74_v11  ;;  %v75_v16 = vld [vmem:[#allocation2 + $0x50] sm:$0xff]  ;;  %v78_v17 = vld [vmem:[#allocation2 + $0x68] sm:$0xff]  ;;  %v80_v18 = vld [vmem:[#allocation2 + $0x78] sm:$0xff] }
  0x2c   :  { %811 = vmatprep.subr.bf16.mxu0 %v810_v8  ;;  %v816_v19 = vpack.c.bf16 %v75_v16, %v73_v15  ;;  %v818_v20 = vpack.c.bf16 %v80_v18, %v78_v17  ;;  %v77_v21 = vld [vmem:[#allocation2 + $0x60] sm:$0xff]  ;;  %v79_v22 = vld [vmem:[#allocation2 + $0x70] sm:$0xff]  ;;  %v82_v23 = vld [vmem:[#allocation2 + $0x88] sm:$0xff] }
  0x2d   :  { %v84_v24 = vld [vmem:[#allocation2 + $0x98] sm:$0xff]  ;;  %v820_v25 = vpack.c.bf16 %v79_v22, %v77_v21  ;;  %v81_v27 = vld [vmem:[#allocation2 + $0x80] sm:$0xff]  ;;  %v83_v28 = vld [vmem:[#allocation2 + $0x90] sm:$0xff] }
  0x2e   :  { %v822_v26 = vpack.c.bf16 %v84_v24, %v82_v23  ;;  %v86_v29 = vld [vmem:[#allocation2 + $0xa8] sm:$0xff]  ;;  %v88_v30 = vld [vmem:[#allocation2 + $0xb8] sm:$0xff]  ;;  %v824_v31 = vpack.c.bf16 %v83_v28, %v81_v27  ;;  %v85_v33 = vld [vmem:[#allocation2 + $0xa0] sm:$0xff] }
  0x2f   :  { %813 = vmatpush1.bf16.msra.mxu0 %v812_v13  ;;  %v826_v32 = vpack.c.bf16 %v88_v30, %v86_v29  ;;  %v87_v34 = vld [vmem:[#allocation2 + $0xb0] sm:$0xff]  ;;  %v90_v35 = vld [vmem:[#allocation2 + $0xc8] sm:$0xff]  ;;  %v92_v36 = vld [vmem:[#allocation2 + $0xd8] sm:$0xff] }
  0x30   :  { %815 = vmatprep.subr.bf16.mxu0 %v814_v14  ;;  %v828_v37 = vpack.c.bf16 %v87_v34, %v85_v33  ;;  %v830_v38 = vpack.c.bf16 %v92_v36, %v90_v35  ;;  %v89_v39 = vld [vmem:[#allocation2 + $0xc0] sm:$0xff]  ;;  %v91_v40 = vld [vmem:[#allocation2 + $0xd0] sm:$0xff]  ;;  %v62_v41 = vld [vmem:[%s1334_s0 + $0x8] sm:$0xff] }
  0x31   :  { %v94_v42 = vld [vmem:[#allocation2 + $0xe8] sm:$0xff]  ;;  %v96_v43 = vld [vmem:[#allocation2 + $0xf8] sm:$0xff]  ;;  %269 = vmatprep.mubr.f32.mxu0 %v62_v41  ;;  %v832_v44 = vpack.c.bf16 %v91_v40, %v89_v39  ;;  %v93_v46 = vld [vmem:[#allocation2 + $0xe0] sm:$0xff] }
  0x32   :  { %v834_v45 = vpack.c.bf16 %v96_v43, %v94_v42  ;;  %v95_v47 = vld [vmem:[#allocation2 + $0xf0] sm:$0xff]  ;;  %v98_v48 = vld [vmem:[#allocation2 + $0x108] sm:$0xff]  ;;  %v100_v49 = vld [vmem:[#allocation2 + $0x118] sm:$0xff] }
  0x33   :  { %817 = vmatpush1.bf16.msra.mxu0 %v816_v19  ;;  %v836_v50 = vpack.c.bf16 %v95_v47, %v93_v46  ;;  %v838_v51 = vpack.c.bf16 %v100_v49, %v98_v48  ;;  %v97_v52 = vld [vmem:[#allocation2 + $0x100] sm:$0xff]  ;;  %v99_v53 = vld [vmem:[#allocation2 + $0x110] sm:$0xff]  ;;  %v102_v54 = vld [vmem:[#allocation2 + $0x128] sm:$0xff] }
  0x34   :  { %819 = vmatprep.subr.bf16.mxu0 %v818_v20  ;;  %v104_v55 = vld [vmem:[#allocation2 + $0x138] sm:$0xff]  ;;  %v840_v56 = vpack.c.bf16 %v99_v53, %v97_v52  ;;  %v101_v58 = vld [vmem:[#allocation2 + $0x120] sm:$0xff]  ;;  %v103_v59 = vld [vmem:[#allocation2 + $0x130] sm:$0xff] }
  0x35   :  { %v842_v57 = vpack.c.bf16 %v104_v55, %v102_v54  ;;  %v106_v60 = vld [vmem:[#allocation2 + $0x148] sm:$0xff]  ;;  %v108_v61 = vld [vmem:[#allocation2 + $0x158] sm:$0xff]  ;;  %v844_v62 = vpack.c.bf16 %v103_v59, %v101_v58  ;;  %v105_v0 = vld [vmem:[#allocation2 + $0x140] sm:$0xff] }
  0x36   :  { %v846_v63 = vpack.c.bf16 %v108_v61, %v106_v60  ;;  %v107_v1 = vld [vmem:[#allocation2 + $0x150] sm:$0xff]  ;;  %v110_v2 = vld [vmem:[#allocation2 + $0x168] sm:$0xff]  ;;  %v112_v3 = vld [vmem:[#allocation2 + $0x178] sm:$0xff] }
  0x37   :  { %821 = vmatpush1.bf16.msra.mxu0 %v820_v25  ;;  %v848_v4 = vpack.c.bf16 %v107_v1, %v105_v0  ;;  %v850_v5 = vpack.c.bf16 %v112_v3, %v110_v2  ;;  %v109_v6 = vld [vmem:[#allocation2 + $0x160] sm:$0xff]  ;;  %v111_v7 = vld [vmem:[#allocation2 + $0x170] sm:$0xff]  ;;  %v114_v8 = vld [vmem:[#allocation2 + $0x188] sm:$0xff] }
  0x38   :  { %823 = vmatprep.subr.bf16.mxu0 %v822_v26  ;;  %v116_v9 = vld [vmem:[#allocation2 + $0x198] sm:$0xff]  ;;  %v113_v10 = vld [vmem:[#allocation2 + $0x180] sm:$0xff]  ;;  %v115_v11 = vld [vmem:[#allocation2 + $0x190] sm:$0xff]  ;;  %v852_v12 = vpack.c.bf16 %v111_v7, %v109_v6 }
  0x39   :  { %v118_v13 = vld [vmem:[#allocation2 + $0x1a8] sm:$0xff]  ;;  %v120_v14 = vld [vmem:[#allocation2 + $0x1b8] sm:$0xff]  ;;  %v365_v15 = vld [vmem:[#allocation5 + $0x80] sm:$0xff]  ;;  %v854_v18 = vpack.c.bf16 %v116_v9, %v114_v8  ;;  %v856_v29 = vpack.c.bf16 %v115_v11, %v113_v10 }
  0x3a   :  { %v366_v16 = vld [vmem:[#allocation5 + $0x88] sm:$0xff]  ;;  %v349_v17 = vld [vmem:[#allocation5] sm:$0xff]  ;;  %v367_v21 = vld [vmem:[#allocation5 + $0x90] sm:$0xff]  ;;  %v858_v33 = vpack.c.bf16 %v120_v14, %v118_v13 }
  0x3b   :  { %825 = vmatpush1.bf16.msra.mxu0 %v824_v31  ;;  %v934_v19 = vpack.c.bf16 %v366_v16, %v365_v15  ;;  %v350_v20 = vld [vmem:[#allocation5 + $0x8] sm:$0xff]  ;;  %v368_v22 = vld [vmem:[#allocation5 + $0x98] sm:$0xff]  ;;  %v351_v25 = vld [vmem:[#allocation5 + $0x10] sm:$0xff] }
  0x3c   :  { %827 = vmatprep.subr.bf16.mxu0 %v826_v32  ;;  %v936_v23 = vpack.c.bf16 %v350_v20, %v349_v17  ;;  %v938_v24 = vpack.c.bf16 %v368_v22, %v367_v21  ;;  %v352_v26 = vld [vmem:[#allocation5 + $0x18] sm:$0xff]  ;;  %v369_v27 = vld [vmem:[#allocation5 + $0xa0] sm:$0xff]  ;;  %v370_v28 = vld [vmem:[#allocation5 + $0xa8] sm:$0xff] }
  0x3d   :  { %935 = vmatprep.subr.bf16.mxu1 %v934_v19  ;;  %v117_v30 = vld [vmem:[#allocation2 + $0x1a0] sm:$0xff]  ;;  %v119_v31 = vld [vmem:[#allocation2 + $0x1b0] sm:$0xff]  ;;  %v940_v32 = vpack.c.bf16 %v352_v26, %v351_v25  ;;  %v122_v34 = vld [vmem:[#allocation2 + $0x1c8] sm:$0xff]  ;;  %v942_v35 = vpack.c.bf16 %v370_v28, %v369_v27 }
  0x3e   :  { %937 = vmatpush3.bf16.msra.mxu1 %v936_v23  ;;  %v353_v36 = vld [vmem:[#allocation5 + $0x20] sm:$0xff]  ;;  %v371_v39 = vld [vmem:[#allocation5 + $0xb0] sm:$0xff]  ;;  %v372_v40 = vld [vmem:[#allocation5 + $0xb8] sm:$0xff]  ;;  %v860_v41 = vpack.c.bf16 %v119_v31, %v117_v30 }
  0x3f   :  { %829 = vmatpush1.bf16.msra.mxu0 %v828_v37  ;;  %939 = vmatprep.subr.bf16.mxu1 %v938_v24  ;;  %v354_v37 = vld [vmem:[#allocation5 + $0x28] sm:$0xff]  ;;  %v121_v42 = vld [vmem:[#allocation2 + $0x1c0] sm:$0xff]  ;;  %v123_v43 = vld [vmem:[#allocation2 + $0x1d0] sm:$0xff]  ;;  %v946_v47 = vpack.c.bf16 %v372_v40, %v371_v39 }
  0x40   :  { %831 = vmatprep.subr.bf16.mxu0 %v830_v38  ;;  %v124_v38 = vld [vmem:[#allocation2 + $0x1d8] sm:$0xff]  ;;  %v126_v46 = vld [vmem:[#allocation2 + $0x1e8] sm:$0xff]  ;;  %v355_v48 = vld [vmem:[#allocation5 + $0x30] sm:$0xff]  ;;  %v864_v53 = vpack.c.bf16 %v123_v43, %v121_v42 }
  0x41   :  { %v356_v49 = vld [vmem:[#allocation5 + $0x38] sm:$0xff]  ;;  %v374_v52 = vld [vmem:[#allocation5 + $0xc8] sm:$0xff]  ;;  %v125_v54 = vld [vmem:[#allocation2 + $0x1e0] sm:$0xff] }
  0x42   :  { %941 = vmatpush3.bf16.msra.mxu1 %v940_v32  ;;  %v127_v55 = vld [vmem:[#allocation2 + $0x1f0] sm:$0xff]  ;;  %v130_v58 = vld [vmem:[#allocation2 + $0x208] sm:$0xff]  ;;  %v357_v60 = vld [vmem:[#allocation5 + $0x40] sm:$0xff] }
  0x43   :  { %833 = vmatpush1.bf16.msra.mxu0 %v832_v44  ;;  %v944_v44 = vpack.c.bf16 %v354_v37, %v353_v36  ;;  %943 = vmatprep.subr.bf16.mxu1 %v942_v35  ;;  %v358_v61 = vld [vmem:[#allocation5 + $0x48] sm:$0xff]  ;;  %v376_v0 = vld [vmem:[#allocation5 + $0xd8] sm:$0xff]  ;;  %v868_v1 = vpack.c.bf16 %v127_v55, %v125_v54  ;;  %v359_v9 = vld [vmem:[#allocation5 + $0x50] sm:$0xff] }
  0x44   :  { %835 = vmatprep.subr.bf16.mxu0 %v834_v45  ;;  %v862_v45 = vpack.c.bf16 %v124_v38, %v122_v34  ;;  %v952_v2 = vpack.c.bf16 %v358_v61, %v357_v60  ;;  %v134_v6 = vld [vmem:[#allocation2 + $0x228] sm:$0xff]  ;;  %v136_v8 = vld [vmem:[#allocation2 + $0x238] sm:$0xff]  ;;  %v377_v11 = vld [vmem:[#allocation5 + $0xe0] sm:$0xff] }
  0x45   :  { %v360_v10 = vld [vmem:[#allocation5 + $0x58] sm:$0xff]  ;;  %v61_v13 = vld [vmem:[%s1334_s0] sm:$0xff]  ;;  %v874_v15 = vpack.c.bf16 %v136_v8, %v134_v6  ;;  %v135_v17 = vld [vmem:[#allocation2 + $0x230] sm:$0xff] }
  0x46   :  { %945 = vmatpush3.bf16.msra.mxu1 %v944_v44  ;;  %v133_v16 = vld [vmem:[#allocation2 + $0x220] sm:$0xff]  ;;  %v956_v19 = vpack.c.bf16 %v360_v10, %v359_v9  ;;  %v138_v20 = vld [vmem:[#allocation2 + $0x248] sm:$0xff]  ;;  %v140_v21 = vld [vmem:[#allocation2 + $0x258] sm:$0xff] }
  0x47   :  { %837 = vmatpush1.bf16.msra.mxu0 %v836_v50  ;;  %v128_v50 = vld [vmem:[#allocation2 + $0x1f8] sm:$0xff]  ;;  %947 = vmatprep.subr.bf16.mxu1 %v946_v47  ;;  %v876_v23 = vpack.c.bf16 %v135_v17, %v133_v16  ;;  %v878_v24 = vpack.c.bf16 %v140_v21, %v138_v20  ;;  %v137_v25 = vld [vmem:[#allocation2 + $0x240] sm:$0xff]  ;;  %v139_v26 = vld [vmem:[#allocation2 + $0x250] sm:$0xff] }
  0x48   :  { %839 = vmatprep.subr.bf16.mxu0 %v838_v51  ;;  %v373_v51 = vld [vmem:[#allocation5 + $0xc0] sm:$0xff]  ;;  %v142_v27 = vld [vmem:[#allocation2 + $0x268] sm:$0xff]  ;;  %v144_v28 = vld [vmem:[#allocation2 + $0x278] sm:$0xff] }
  0x49   :  { %v950_v59 = vpack.c.bf16 %v374_v52, %v373_v51  ;;  %v882_v30 = vpack.c.bf16 %v144_v28, %v142_v27  ;;  %v141_v31 = vld [vmem:[#allocation2 + $0x260] sm:$0xff]  ;;  %v143_v32 = vld [vmem:[#allocation2 + $0x270] sm:$0xff]  ;;  %v148_v34 = vld [vmem:[#allocation2 + $0x298] sm:$0xff] }
  0x4a   :  { %v884_v35 = vpack.c.bf16 %v143_v32, %v141_v31  ;;  %v145_v37 = vld [vmem:[#allocation2 + $0x280] sm:$0xff]  ;;  %v147_v38 = vld [vmem:[#allocation2 + $0x290] sm:$0xff]  ;;  %v150_v39 = vld [vmem:[#allocation2 + $0x2a8] sm:$0xff] }
  0x4b   :  { %841 = vmatpush1.bf16.msra.mxu0 %v840_v56  ;;  %v948_v56 = vpack.c.bf16 %v356_v49, %v355_v48  ;;  %v152_v40 = vld [vmem:[#allocation2 + $0x2b8] sm:$0xff]  ;;  %v149_v43 = vld [vmem:[#allocation2 + $0x2a0] sm:$0xff]  ;;  %v151_v44 = vld [vmem:[#allocation2 + $0x2b0] sm:$0xff] }
  0x4c   :  { %843 = vmatprep.subr.bf16.mxu0 %v842_v57  ;;  %v866_v57 = vpack.c.bf16 %v128_v50, %v126_v46  ;;  %v890_v42 = vpack.c.bf16 %v152_v40, %v150_v39  ;;  %v156_v46 = vld [vmem:[#allocation2 + $0x2d8] sm:$0xff]  ;;  %v892_v47 = vpack.c.bf16 %v151_v44, %v149_v43  ;;  %v153_v49 = vld [vmem:[#allocation2 + $0x2c0] sm:$0xff]  ;;  %v155_v50 = vld [vmem:[#allocation2 + $0x2d0] sm:$0xff] }
  0x4d   :  { %949 = vmatpush3.bf16.msra.mxu1 %v948_v56  ;;  %v158_v51 = vld [vmem:[#allocation2 + $0x2e8] sm:$0xff]  ;;  %v160_v52 = vld [vmem:[#allocation2 + $0x2f8] sm:$0xff]  ;;  %v157_v55 = vld [vmem:[#allocation2 + $0x2e0] sm:$0xff] }
  0x4e   :  { %951 = vmatprep.subr.bf16.mxu1 %v950_v59  ;;  %v898_v54 = vpack.c.bf16 %v160_v52, %v158_v51  ;;  %v159_v56 = vld [vmem:[#allocation2 + $0x2f0] sm:$0xff]  ;;  %v161_v61 = vld [vmem:[#allocation2 + $0x300] sm:$0xff]  ;;  %v172_v6 = vld [vmem:[#allocation2 + $0x358] sm:$0xff]  ;;  %v1106_v52 = vmov 0.0|0.0  }
  0x4f   :  { %845 = vmatpush1.bf16.msra.mxu0 %v844_v62  ;;  %v132_v62 = vld [vmem:[#allocation2 + $0x218] sm:$0xff]  ;;  %v900_v59 = vpack.c.bf16 %v159_v56, %v157_v55  ;;  %v169_v9 = vld [vmem:[#allocation2 + $0x340] sm:$0xff]  ;;  %v171_v10 = vld [vmem:[#allocation2 + $0x350] sm:$0xff] }
  0x50   :  { %847 = vmatprep.subr.bf16.mxu0 %v846_v63  ;;  %v375_v63 = vld [vmem:[#allocation5 + $0xd0] sm:$0xff]  ;;  %v870_v3 = vpack.c.bf16 %v132_v62, %v130_v58  ;;  %v164_v58 = vld [vmem:[#allocation2 + $0x318] sm:$0xff]  ;;  %v178_v17 = vld [vmem:[#allocation2 + $0x388] sm:$0xff] }
  0x51   :  { %v954_v7 = vpack.c.bf16 %v376_v0, %v375_v63  ;;  %953 = vmatpush3.bf16.msra.mxu1 %v952_v2  ;;  %v163_v62 = vld [vmem:[#allocation2 + $0x310] sm:$0xff]  ;;  %v166_v63 = vld [vmem:[#allocation2 + $0x328] sm:$0xff]  ;;  %v168_v0 = vld [vmem:[#allocation2 + $0x338] sm:$0xff] }
  0x52   :  { %v906_v2 = vpack.c.bf16 %v168_v0, %v166_v63  ;;  %v175_v16 = vld [vmem:[#allocation2 + $0x370] sm:$0xff]  ;;  %v177_v21 = vld [vmem:[#allocation2 + $0x380] sm:$0xff]  ;;  %v362_v44 = vld [vmem:[#allocation5 + $0x68] sm:$0xff] }
  0x53   :  { %849 = vmatpush1.bf16.msra.mxu0 %v848_v4  ;;  %v129_v4 = vld [vmem:[#allocation2 + $0x200] sm:$0xff]  ;;  %955 = vmatprep.subr.bf16.mxu1 %v954_v7  ;;  %v183_v28 = vld [vmem:[#allocation2 + $0x3b0] sm:$0xff]  ;;  %v460_v0 = vld [vmem:[%s1339_s5 + $0x8] sm:$0xff] }
  0x54   :  { %851 = vmatprep.subr.bf16.mxu0 %v850_v5  ;;  %v131_v5 = vld [vmem:[#allocation2 + $0x210] sm:$0xff]  ;;  %v181_v27 = vld [vmem:[#allocation2 + $0x3a0] sm:$0xff] }
  0x55   :  { %v872_v14 = vpack.c.bf16 %v131_v5, %v129_v4  ;;  %957 = vmatpush3.bf16.msra.mxu1 %v956_v19  ;;  %v167_v4 = vld [vmem:[#allocation2 + $0x330] sm:$0xff]  ;;  %v170_v5 = vld [vmem:[#allocation2 + $0x348] sm:$0xff]  ;;  %v924_v31 = vpack.c.bf16 %v183_v28, %v181_v27  ;;  %v189_v39 = vld [vmem:[#allocation2 + $0x3e0] sm:$0xff] }
  0x56   :  { %v910_v8 = vpack.c.bf16 %v172_v6, %v170_v5  ;;  %v191_v40 = vld [vmem:[#allocation2 + $0x3f0] sm:$0xff]  ;;  %v361_v43 = vld [vmem:[#allocation5 + $0x60] sm:$0xff]  ;;  %v462_v6 = vld [vmem:[%s1339_s5 + $0x18] sm:$0xff] }
  0x57   :  { %853 = vmatpush1.bf16.msra.mxu0 %v852_v12  ;;  %v378_v12 = vld [vmem:[#allocation5 + $0xe8] sm:$0xff]  ;;  %v193_v56 = vld [vmem:[%s1336_s2] sm:$0x3]  ;;  %v461_v5 = vld [vmem:[%s1339_s5 + $0x10] sm:$0xff] }
  0x58   :  { %855 = vmatprep.subr.bf16.mxu0 %v854_v18  ;;  %v64_v18 = vld [vmem:[%s1334_s0 + $0x18] sm:$0xff]  ;;  %v958_v22 = vpack.c.bf16 %v378_v12, %v377_v11  ;;  %v174_v11 = vld [vmem:[#allocation2 + $0x368] sm:$0xff]  ;;  %v459_v63 = vld [vmem:[%s1339_s5] sm:$0xff] }
  0x59   :  { %v176_v12 = vld [vmem:[#allocation2 + $0x378] sm:$0xff]  ;;  %v664_v28 = vld [vmem:[%s1338_s4] ss:$0 sm:$0xff] }
  0x5a   :  { %959 = vmatprep.subr.bf16.mxu1 %v958_v22  ;;  %v179_v22 = vld [vmem:[#allocation2 + $0x390] sm:$0xff] }
  0x5b   :  { %857 = vmatpush1.bf16.msra.mxu0 %v856_v29  ;;  %v880_v29 = vpack.c.bf16 %v139_v26, %v137_v25  ;;  %v920_v25 = vpack.c.bf16 %v179_v22, %v177_v21  ;;  %v472_v21 = vld [vmem:[%s1339_s5 + $0x68] sm:$0xff] }
  0x5c   :  { %859 = vmatprep.subr.bf16.mxu0 %v858_v33  ;;  %v146_v33 = vld [vmem:[#allocation2 + $0x288] sm:$0xff] }
  0x5d   :  { %v886_v36 = vpack.c.bf16 %v148_v34, %v146_v33  ;;  %v185_v33 = vld [vmem:[#allocation2 + $0x3c0] sm:$0xff]  ;;  %v187_v34 = vld [vmem:[#allocation2 + $0x3d0] sm:$0xff] }
  0x5f   :  { %861 = vmatpush1.bf16.msra.mxu0 %v860_v41  ;;  %v888_v41 = vpack.c.bf16 %v147_v38, %v145_v37  ;;  %v928_v37 = vpack.c.bf16 %v187_v34, %v185_v33 }
  0x60   :  { %863 = vmatprep.subr.bf16.mxu0 %v862_v45  ;;  %v154_v45 = vld [vmem:[#allocation2 + $0x2c8] sm:$0xff] }
  0x61   :  { %v894_v48 = vpack.c.bf16 %v156_v46, %v154_v45  ;;  %v960_v45 = vpack.c.bf16 %v362_v44, %v361_v43  ;;  %v379_v46 = vld [vmem:[#allocation5 + $0xf0] sm:$0xff]  ;;  %v560_v43 = vld [vmem:[%s1341_s7 + $0x38] sm:$0xff] }
  0x63   :  { %865 = vmatpush1.bf16.msra.mxu0 %v864_v53  ;;  %v896_v53 = vpack.c.bf16 %v155_v50, %v153_v49  ;;  %961 = vmatpush3.bf16.msra.mxu1 %v960_v45  ;;  %v363_v49 = vld [vmem:[#allocation5 + $0x70] sm:$0xff]  ;;  %v364_v50 = vld [vmem:[#allocation5 + $0x78] sm:$0xff]  ;;  %v561_v45 = vld [vmem:[%s1341_s7 + $0x40] sm:$0xff] }
  0x64   :  { %867 = vmatprep.subr.bf16.mxu0 %v866_v57  ;;  %v162_v57 = vld [vmem:[#allocation2 + $0x308] sm:$0xff]  ;;  %v964_v51 = vpack.c.bf16 %v364_v50, %v363_v49  ;;  %v564_v49 = vld [vmem:[%s1341_s7 + $0x58] sm:$0xff] }
  0x65   :  { %v902_v60 = vpack.c.bf16 %v164_v58, %v162_v57 }
  0x67   :  { %869 = vmatpush1.bf16.msra.mxu0 %v868_v1  ;;  %v904_v1 = vpack.c.bf16 %v163_v62, %v161_v61 }
  0x68   :  { %871 = vmatprep.subr.bf16.mxu0 %v870_v3  ;;  %v165_v3 = vld [vmem:[#allocation2 + $0x320] sm:$0xff] }
  0x69   :  { %v908_v7 = vpack.c.bf16 %v167_v4, %v165_v3  ;;  %v967_v3 = vpack.c.bf16 %v460_v0, %v459_v63 }
  0x6a   :  { %270 = vmatmul.mubr.f32.vlgmr.msra.gmra.mrb[0].mxu0 %v61_v13  ;;  %v912_v13 = vpack.c.bf16 %v171_v10, %v169_v9  ;;  %v464_v9 = vld [vmem:[%s1339_s5 + $0x28] sm:$0xff] }
  0x6b   :  { %873 = vmatpush1.bf16.msra.mxu0 %v872_v14  ;;  %340 = vmatprep.mubr.f32.mxu0 %v64_v18  ;;  %v914_v14 = vpack.c.bf16 %v176_v12, %v174_v11  ;;  %v180_v18 = vld [vmem:[#allocation2 + $0x398] sm:$0xff]  ;;  %v465_v11 = vld [vmem:[%s1339_s5 + $0x30] sm:$0xff] }
  0x6c   :  { %875 = vmatprep.subr.bf16.mxu0 %v874_v15  ;;  %v173_v15 = vld [vmem:[#allocation2 + $0x360] sm:$0xff]  ;;  %v918_v20 = vpack.c.bf16 %v180_v18, %v178_v17  ;;  %v466_v12 = vld [vmem:[%s1339_s5 + $0x38] sm:$0xff]  ;;  %v469_v17 = vld [vmem:[%s1339_s5 + $0x50] sm:$0xff] }
  0x6d   :  { %v916_v19 = vpack.c.bf16 %v175_v16, %v173_v15  ;;  %v468_v15 = vld [vmem:[%s1339_s5 + $0x48] sm:$0xff]  ;;  %v470_v18 = vld [vmem:[%s1339_s5 + $0x58] sm:$0xff] }
  0x6f   :  { %877 = vmatpush1.bf16.msra.mxu0 %v876_v23  ;;  %v182_v23 = vld [vmem:[#allocation2 + $0x3a8] sm:$0xff] }
  0x70   :  { %879 = vmatprep.subr.bf16.mxu0 %v878_v24  ;;  %v184_v24 = vld [vmem:[#allocation2 + $0x3b8] sm:$0xff] }
  0x71   :  { %v922_v26 = vpack.c.bf16 %v184_v24, %v182_v23  ;;  %v473_v23 = vld [vmem:[%s1339_s5 + $0x70] sm:$0xff]  ;;  %v474_v24 = vld [vmem:[%s1339_s5 + $0x78] sm:$0xff] }
  0x73   :  { %881 = vmatpush1.bf16.msra.mxu0 %v880_v29  ;;  %v186_v29 = vld [vmem:[#allocation2 + $0x3c8] sm:$0xff] }
  0x74   :  { %883 = vmatprep.subr.bf16.mxu0 %v882_v30  ;;  %v188_v30 = vld [vmem:[#allocation2 + $0x3d8] sm:$0xff] }
  0x75   :  { %v926_v32 = vpack.c.bf16 %v188_v30, %v186_v29 }
  0x77   :  { %885 = vmatpush1.bf16.msra.mxu0 %v884_v35  ;;  %v190_v35 = vld [vmem:[#allocation2 + $0x3e8] sm:$0xff] }
  0x78   :  { %887 = vmatprep.subr.bf16.mxu0 %v886_v36  ;;  %v192_v36 = vld [vmem:[#allocation2 + $0x3f8] sm:$0xff] }
  0x79   :  { %v930_v38 = vpack.c.bf16 %v192_v36, %v190_v35  ;;  %v555_v36 = vld [vmem:[%s1341_s7 + $0x10] sm:$0xff] }
  0x7b   :  { %889 = vmatpush1.bf16.msra.mxu0 %v888_v41  ;;  %v932_v41 = vpack.c.bf16 %v191_v40, %v189_v39  ;;  %v557_v39 = vld [vmem:[%s1341_s7 + $0x20] sm:$0xff]  ;;  %v558_v40 = vld [vmem:[%s1341_s7 + $0x28] sm:$0xff] }
  0x7c   :  { %891 = vmatprep.subr.bf16.mxu0 %v890_v42  ;;  %v63_v42 = vld [vmem:[%s1334_s0 + $0x10] sm:$0xff] }
  0x7f   :  { %893 = vmatpush1.bf16.msra.mxu0 %v892_v47  ;;  %v380_v47 = vld [vmem:[#allocation5 + $0xf8] sm:$0xff] }
  0x80   :  { %895 = vmatprep.subr.bf16.mxu0 %v894_v48  ;;  %v962_v48 = vpack.c.bf16 %v380_v47, %v379_v46  ;;  %v562_v46 = vld [vmem:[%s1341_s7 + $0x48] sm:$0xff] }
  0x81   :  { %v1003_v47 = vpack.c.bf16 %v562_v46, %v561_v45 }
  0x82   :  { %963 = vmatprep.subr.bf16.mxu1 %v962_v48  ;;  %v563_v48 = vld [vmem:[%s1341_s7 + $0x50] sm:$0xff] }
  0x83   :  { %897 = vmatpush1.bf16.msra.mxu0 %v896_v53  ;;  %965 = vmatpush3.bf16.msra.mxu1 %v964_v51  ;;  %v195_v53 = vlaneseq  ;;  %v1006_v50 = vpack.c.bf16 %v564_v49, %v563_v48  ;;  %v565_v51 = vld [vmem:[%s1341_s7 + $0x60] sm:$0xff] }
  0x84   :  { %899 = vmatprep.subr.bf16.mxu0 %v898_v54  ;;  %966 = vmatprep.subr.bf16.mxu1 %v1106_v52 }
  0x85   :  { %v196_v54 = vshrl.u32 %v195_v53, 7  ;;  %v566_v53 = vld [vmem:[%s1341_s7 + $0x68] sm:$0xff] }
  0x87   :  { %901 = vmatpush1.bf16.msra.mxu0 %v900_v59  ;;  %v197_v55 = vsub.s32 0, %v196_v54  ;;  %v201_v57 = vsub.s32 1, %v196_v54  ;;  %v1009_v54 = vpack.c.bf16 %v566_v53, %v565_v51 }
  0x88   :  { %903 = vmatprep.subr.bf16.mxu0 %v902_v60 }
  0x89   :  { %v198_v58 = vrot.slane %v193_v56, %v197_v55  ;;  %v202_v59 = vrot.slane %v193_v56, %v201_v57  ;;  %v567_v55 = vld [vmem:[%s1341_s7 + $0x70] sm:$0xff]  ;;  %v568_v56 = vld [vmem:[%s1341_s7 + $0x78] sm:$0xff] }
  0x8a   :  { %v1012_v57 = vpack.c.bf16 %v568_v56, %v567_v55 }
  0x8b   :  { %905 = vmatpush1.bf16.msra.mxu0 %v904_v1 }
  0x8c   :  { %907 = vmatprep.subr.bf16.mxu0 %v906_v2 }
  0x8f   :  { %909 = vmatpush1.bf16.msra.mxu0 %v908_v7  ;;  %v970_v7 = vpack.c.bf16 %v462_v6, %v461_v5 }
  0x90   :  { %911 = vmatprep.subr.bf16.mxu0 %v910_v8  ;;  %v463_v8 = vld [vmem:[%s1339_s5 + $0x20] sm:$0xff] }
  0x91   :  { %v973_v10 = vpack.c.bf16 %v464_v9, %v463_v8 }
  0x93   :  { %913 = vmatpush1.bf16.msra.mxu0 %v912_v13  ;;  %v976_v13 = vpack.c.bf16 %v466_v12, %v465_v11 }
  0x94   :  { %915 = vmatprep.subr.bf16.mxu0 %v914_v14  ;;  %v467_v14 = vld [vmem:[%s1339_s5 + $0x40] sm:$0xff] }
  0x95   :  { %v979_v16 = vpack.c.bf16 %v468_v15, %v467_v14 }
  0x97   :  { %917 = vmatpush1.bf16.msra.mxu0 %v916_v19  ;;  %v982_v19 = vpack.c.bf16 %v470_v18, %v469_v17 }
  0x98   :  { %919 = vmatprep.subr.bf16.mxu0 %v918_v20  ;;  %v471_v20 = vld [vmem:[%s1339_s5 + $0x60] sm:$0xff] }
  0x99   :  { %v985_v22 = vpack.c.bf16 %v472_v21, %v471_v20 }
  0x9b   :  { %921 = vmatpush1.bf16.msra.mxu0 %v920_v25  ;;  %v988_v25 = vpack.c.bf16 %v474_v24, %v473_v23 }
  0x9c   :  { %923 = vmatprep.subr.bf16.mxu0 %v922_v26  ;;  %v1108_v26 = vmov 0.0  }
  0x9f   :  { %925 = vmatpush1.bf16.msra.mxu0 %v924_v31  ;;  %v553_v31 = vld [vmem:[%s1341_s7] sm:$0xff] }
  0xa0   :  { %927 = vmatprep.subr.bf16.mxu0 %v926_v32  ;;  %v554_v32 = vld [vmem:[%s1341_s7 + $0x8] sm:$0xff] }
  0xa1   :  { %v991_v34 = vpack.c.bf16 %v554_v32, %v553_v31 }
  0xa3   :  { %929 = vmatpush1.bf16.msra.mxu0 %v928_v37  ;;  %v556_v37 = vld [vmem:[%s1341_s7 + $0x18] sm:$0xff] }
  0xa4   :  { %931 = vmatprep.subr.bf16.mxu0 %v930_v38  ;;  %v994_v38 = vpack.c.bf16 %v556_v37, %v555_v36 }
  0xa7   :  { %933 = vmatpush1.bf16.msra.mxu0 %v932_v41  ;;  %v997_v41 = vpack.c.bf16 %v558_v40, %v557_v39 }
  0xaa   :  { %341 = vmatmul.mubr.f32.vlgmr.msra.gmra.mrb[0].mxu0 %v63_v42  ;;  %v559_v42 = vld [vmem:[%s1341_s7 + $0x30] sm:$0xff]  ;;  %s1072_s7 = scalar_lea.vmem %s655_s16, 128 }
  0xab   :  { %v1000_v44 = vpack.c.bf16 %v560_v43, %v559_v42  ;;  %p1073_p2 = scmp.ne.s32.totalorder %s655_s16, %s1072_s7  ;;  %p1078_p4 = scmp.lt.s32.totalorder %s1072_s7, %s1072_s7 }
  0xad   :  { %p1079_p5 = por %p1078_p4, %p1077_p3 }
  0xaf   :  { %p1080_p6 = pnand %p1079_p5, %p1073_p2 }
 0x17d   :  { %v342_v60 = vpop.f32.mrb[0].mxu0 }
 0x17e   :  { %v1014_v61 = vadd.f32 %v342_v60, %v198_v58  ;;  %v344_v62 = vpop.f32.mrb[1].mxu0  ;;  %v665_v58 = vld [vmem:[%s1340_s6] ss:$0 sm:$0xff] }
 0x17f   :  { %v1015_v1 = vadd.f32 %v344_v62, %v202_v59 }
 0x180   :  { %v347_v4 = vmax.f32 %v1014_v61, 0.0 }
 0x181   :  { %v348_v2 = vmax.f32 %v1015_v1, 0.0 }
 0x183   :  { %452 = vmatprep.mubr.f32.mxu1 %v348_v2 }
 0x184   :  { %453 = vmatmul.mubr.f32.vlgmr.msra.gmra.mrb[0].mxu1 %v347_v4 }
 0x185   :  { %968 = vmatpush3.bf16.msra.mxu1 %v967_v3  ;;  %768 = vmatprep.mubr.msk.f32.mxu1 %vm1107_vm0, %v1108_v26 }
 0x186   :  { %969 = vmatprep.subr.bf16.mxu1 %v1106_v52 }
 0x189   :  { %971 = vmatpush3.bf16.msra.mxu1 %v970_v7 }
 0x18a   :  { %972 = vmatprep.subr.bf16.mxu1 %v1106_v52 }
 0x18d   :  { %974 = vmatpush3.bf16.msra.mxu1 %v973_v10 }
 0x18e   :  { %975 = vmatprep.subr.bf16.mxu1 %v1106_v52 }
 0x191   :  { %977 = vmatpush3.bf16.msra.mxu1 %v976_v13 }
 0x192   :  { %978 = vmatprep.subr.bf16.mxu1 %v1106_v52 }
 0x195   :  { %980 = vmatpush3.bf16.msra.mxu1 %v979_v16 }
 0x196   :  { %981 = vmatprep.subr.bf16.mxu1 %v1106_v52 }
 0x199   :  { %983 = vmatpush3.bf16.msra.mxu1 %v982_v19 }
 0x19a   :  { %984 = vmatprep.subr.bf16.mxu1 %v1106_v52 }
 0x19d   :  { %986 = vmatpush3.bf16.msra.mxu1 %v985_v22 }
 0x19e   :  { %987 = vmatprep.subr.bf16.mxu1 %v1106_v52 }
 0x1a1   :  { %989 = vmatpush3.bf16.msra.mxu1 %v988_v25 }
 0x1a2   :  { %990 = vmatprep.subr.bf16.mxu1 %v1106_v52 }
 0x257   :  { %v699_v27 = vpop.f32.mrb[0].mxu1 }
 0x258   :  { %v700_v29 = vpop.f32.mrb[1].mxu1 }
 0x259   :  { %v701_v30 = vadd.f32 %v700_v29, %v699_v27 }
 0x25b   :  { %v455_v33 = vadd.f32 %v701_v30, %v664_v28 }
 0x25d   :  { %v458_v35 = vmax.f32 %v455_v33, 0.0 }
 0x25f   :  { %769 = vmatmul.mubr.f32.vlgmr.msra.gmra.mrb[2].mxu1 %v458_v35 }
 0x260   :  { %992 = vmatpush3.bf16.msra.mxu1 %v991_v34  ;;  %803 = vmatprep.mubr.msk.f32.mxu1 %vm1107_vm0, %v1108_v26 }
 0x261   :  { %993 = vmatprep.subr.bf16.mxu1 %v1106_v52 }
 0x264   :  { %995 = vmatpush3.bf16.msra.mxu1 %v994_v38 }
 0x265   :  { %996 = vmatprep.subr.bf16.mxu1 %v1106_v52 }
 0x268   :  { %998 = vmatpush3.bf16.msra.mxu1 %v997_v41 }
 0x269   :  { %999 = vmatprep.subr.bf16.mxu1 %v1106_v52 }
 0x26c   :  { %1001 = vmatpush3.bf16.msra.mxu1 %v1000_v44 }
 0x26d   :  { %1002 = vmatprep.subr.bf16.mxu1 %v1106_v52 }
 0x270   :  { %1004 = vmatpush3.bf16.msra.mxu1 %v1003_v47 }
 0x271   :  { %1005 = vmatprep.subr.bf16.mxu1 %v1106_v52 }
 0x274   :  { %1007 = vmatpush3.bf16.msra.mxu1 %v1006_v50 }
 0x275   :  { %1008 = vmatprep.subr.bf16.mxu1 %v1106_v52 }
 0x278   :  { %1010 = vmatpush3.bf16.msra.mxu1 %v1009_v54 }
 0x279   :  { %1011 = vmatprep.subr.bf16.mxu1 %v1106_v52  ;;  %v666_v52 = vld [vmem:[%s1342_s8] ss:$0 sm:$0xff] }
 0x27c   :  { %1013 = vmatpush3.bf16.msra.mxu1 %v1012_v57 }
 0x332   :  { %v548_v59 = vpop.f32.mrb[2].mxu1 }
 0x333   :  { %v549_v60 = vadd.f32 %v665_v58, %v548_v59  ;;  %v770_v61 = vpop.f32.mrb[3].mxu1 }
 0x335   :  { %v552_v62 = vmax.f32 %v549_v60, 0.0 }
 0x337   :  { %804 = vmatmul.mubr.f32.vlgmr.msra.gmra.mrb[4].mxu1 %v552_v62 }
 0x40a   :  { %v642_v63 = vpop.f32.mrb[4].mxu1 }
 0x40b   :  { %v643_v0 = vadd.f32 %v666_v52, %v642_v63  ;;  %v805_v1 = vpop.f32.mrb[5].mxu1 }
 0x40d   :  { %647 = vst.msk [vmem:[#allocation7] sm:$0xff] %vm646_vm1, %v643_v0 }
 0x40e   :  { %1083 = shalt.err (!%p1080_p6)
}
 0x40f   :  { %s1084_s18 = scalar_lea.hbm %s1343_s9, 128 }
 0x410   :  { %p1085_p7 = scmp.ne.s32.totalorder %s1343_s9, %s1084_s18  ;;  %p1088_p8 = scmp.lt.u32.totalorder %s1084_s18, %s1343_s9 }
 0x412   :  { %p1090_p9 = pnand %p1088_p8, %p1085_p7 }
 0x414   :  { %1093 = shalt.err (!%p1090_p9)
}
 0x415   :  { %657 = dma.vmem_to_hbm [thread:$0]  %s655_s16, 128, %s1343_s9, [#allocation4]  }
 0x416   :  { %1098 = dma.done.wait [#allocation4], 128  }
 0x417   :  { %1099 = vsyncadd [#allocation4], 4294967168 }
 0x418   :  { %661 = vsyncpa [#allocation3], 1 }
 0x419   :  { %662 = vsyncpa [#allocation6], 1 }
 0x41a   :  { %663 = vsyncpa [#allocation4], 1 }

</bundles_post_ra>
